<compile_context>
chip_gen: v5e
topology: v5e:2x2
jax: 0.10.0
libtpu: 0.0.40
codegen_flags: <defaults>
</compile_context>

<pallas_src>
import functools

import jax
import jax.numpy as jnp
import numpy as np
from jax import lax
from jax.experimental import pallas as pl
from jax.experimental.pallas import tpu as pltpu


def _gru_generator_kernel(h0_ref, x0_ref, wih_ref, whh_ref, brz_ref,
                          bni_ref, bnh_ref, wout_ref, bout_ref, emb_ref,
                          gum_ref, out_ref, pred_ref, *, n_steps, inv_temp):
    f32 = jnp.float32
    bf16 = jnp.bfloat16

    # Time-invariant operands: load from VMEM once, hoisted out of the loop.
    w_ir, w_iz, w_in = wih_ref[0], wih_ref[1], wih_ref[2]      # [E, H] bf16
    w_hr, w_hz, w_hn = whh_ref[0], whh_ref[1], whh_ref[2]      # [H, H] bf16
    b_r, b_z = brz_ref[0], brz_ref[1]                          # [1, H] f32 (b_ih+b_hh merged)
    b_in_ = bni_ref[...]                                       # [1, H] f32
    b_hn = bnh_ref[...]                                        # [1, H] f32
    w_out = wout_ref[...]                                      # [H, V] bf16
    b_out = bout_ref[...]                                      # [1, V] f32
    emb = emb_ref[...]                                         # [V, E] bf16

    def step(t, carry):
        h, x = carry                                           # f32 [B,H], bf16 [B,E]
        hb = h.astype(bf16)

        # GRU cell, per-gate lane-aligned dots (PyTorch gate order: r, z, n).
        r = jax.nn.sigmoid(jnp.dot(x, w_ir, preferred_element_type=f32)
                           + jnp.dot(hb, w_hr, preferred_element_type=f32) + b_r)
        zg = jax.nn.sigmoid(jnp.dot(x, w_iz, preferred_element_type=f32)
                            + jnp.dot(hb, w_hz, preferred_element_type=f32) + b_z)
        g_in = jnp.dot(x, w_in, preferred_element_type=f32) + b_in_
        g_hn = jnp.dot(hb, w_hn, preferred_element_type=f32) + b_hn
        n = jnp.tanh(g_in + r * g_hn)
        h_new = (1.0 - zg) * n + zg * h                        # [B, H] f32

        # Output projection to vocab logits.
        pred = jnp.dot(h_new.astype(bf16), w_out,
                       preferred_element_type=f32) + b_out     # [B, V] f32

        # Write into the VMEM-resident output blocks (single HBM writeback at end).
        out_ref[t] = h_new
        pred_ref[t] = pred

        # gumbel-softmax(pred / T) with tau=1  ==  softmax(pred / T + g).
        logits = pred * inv_temp + gum_ref[t]                  # [B, V]
        m = jnp.max(logits, axis=-1, keepdims=True)
        e = jnp.exp(logits - m)
        denom = jnp.sum(e, axis=-1, keepdims=True)
        probs = e * pl.reciprocal(denom, approx=True)

        # Soft embedding feedback: probs @ embed.weight.
        x_new = jnp.dot(probs.astype(bf16), emb,
                        preferred_element_type=f32)            # [B, E] f32
        return h_new, x_new.astype(bf16)

    lax.fori_loop(0, n_steps, step, (h0_ref[...], x0_ref[...]), unroll=True)


def _prep_operands(params):
    """Shared weight prep: per-gate, transposed, lane-aligned, bf16 for the MXU."""
    wih, whh = params["w_ih"], params["w_hh"]                  # [3H,E], [3H,H]
    bih, bhh = params["b_ih"], params["b_hh"]                  # [3H], [3H]
    wout, bout = params["w_out"], params["b_out"]              # [V,H], [V]
    emb = params["embed_weight"]                               # [V,E]
    H = whh.shape[1]

    wih3 = jnp.stack([wih[0:H].T, wih[H:2 * H].T, wih[2 * H:3 * H].T]
                     ).astype(jnp.bfloat16)                    # [3, E, H]
    whh3 = jnp.stack([whh[0:H].T, whh[H:2 * H].T, whh[2 * H:3 * H].T]
                     ).astype(jnp.bfloat16)                    # [3, H, H]
    # r/z biases can be pre-merged; the n-gate needs b_hh separate (r * g_hn term).
    brz = jnp.stack([(bih[0:H] + bhh[0:H])[None, :],
                     (bih[H:2 * H] + bhh[H:2 * H])[None, :]]).astype(jnp.float32)  # [2,1,H]
    bni = bih[2 * H:3 * H][None, :].astype(jnp.float32)        # [1, H]
    bnh = bhh[2 * H:3 * H][None, :].astype(jnp.float32)        # [1, H]
    wout_t = wout.T.astype(jnp.bfloat16)                       # [H, V]
    bout2 = bout[None, :].astype(jnp.float32)                  # [1, V]
    emb_bf = emb.astype(jnp.bfloat16)                          # [V, E]
    return wih3, whh3, brz, bni, bnh, wout_t, bout2, emb_bf


def generator_forward(z, labels, src_len, params, *, temperature,
                      use_gumbel=True, gumbel_key=None):
    """Pallas version of Generator.forward(z, labels, src, src_len, transfered=True)."""
    fc_w, fc_b = params["fc_w"], params["fc_b"]                # [dim_y,1], [dim_y]
    emb = params["embed_weight"]
    bos_id = params["bos_token_id"]

    B = z.shape[0]
    H = params["w_hh"].shape[1]
    E = emb.shape[1]
    V = emb.shape[0]
    # NOTE: src_len must be concrete (host value); mirrors `max(src_len)` in PyTorch.
    T_steps = int(np.max(np.asarray(src_len))) - 1

    # ---- cheap glue in plain JAX ----
    lab = (1.0 - labels.astype(jnp.float32))[:, None]          # [B, 1]
    h0 = jnp.concatenate([lab @ fc_w.T + fc_b, z], axis=-1).astype(jnp.float32)  # [B, H]

    ops = _prep_operands(params)
    wih3, whh3, brz, bni, bnh, wout_t, bout2, emb_bf = ops
    x0 = jnp.broadcast_to(emb_bf[bos_id][None, :], (B, E))     # BOS soft-embedding (bf16)

    if T_steps <= 0:   # guard: max(src_len) == 1 -> no recurrent steps
        empty = jnp.zeros((0, B, V), jnp.float32)
        return h0[None], empty, empty, h0, x0

    if use_gumbel:
        assert gumbel_key is not None
        gnoise = jax.random.gumbel(gumbel_key, (T_steps, B, V), dtype=jnp.float32)
    else:
        gnoise = jnp.zeros((T_steps, B, V), jnp.float32)

    kernel = functools.partial(_gru_generator_kernel, n_steps=T_steps,
                               inv_temp=float(1.0 / temperature))

    # Single invocation (no grid): every operand lives whole in VMEM, outputs are
    # VMEM-resident and written back to HBM exactly once.
    out_steps, pred_steps = pl.pallas_call(
        kernel,
        out_shape=(jax.ShapeDtypeStruct((T_steps, B, H), jnp.float32),
                   jax.ShapeDtypeStruct((T_steps, B, V), jnp.float32)),
    )(h0, x0, wih3, whh3, brz, bni, bnh, wout_t, bout2, emb_bf, gnoise)

    # outputs = torch.cat([h0.unsqueeze(0)] + outputs, 0)
    outputs = jnp.concatenate([h0[None], out_steps], axis=0)   # [T, B, H]
    return outputs, pred_steps, gnoise, h0, x0


def _reference_forward(h0, x0, ops, gnoise, temperature):
    """Pure-JAX reference with the same bf16-matmul / f32-accumulate recipe."""
    wih3, whh3, brz, bni, bnh, wout_t, bout2, emb_bf = ops
    f32 = jnp.float32
    bf16 = jnp.bfloat16
    inv_t = 1.0 / temperature
    T = gnoise.shape[0]
    h, x = h0, x0
    outs, preds = [], []
    for t in range(T):
        hb = h.astype(bf16)
        r = jax.nn.sigmoid(jnp.dot(x, wih3[0], preferred_element_type=f32)
                           + jnp.dot(hb, whh3[0], preferred_element_type=f32) + brz[0])
        zg = jax.nn.sigmoid(jnp.dot(x, wih3[1], preferred_element_type=f32)
                            + jnp.dot(hb, whh3[1], preferred_element_type=f32) + brz[1])
        g_in = jnp.dot(x, wih3[2], preferred_element_type=f32) + bni
        g_hn = jnp.dot(hb, whh3[2], preferred_element_type=f32) + bnh
        n = jnp.tanh(g_in + r * g_hn)
        h = (1.0 - zg) * n + zg * h
        p = jnp.dot(h.astype(bf16), wout_t, preferred_element_type=f32) + bout2
        outs.append(h)
        preds.append(p)
        probs = jax.nn.softmax(p * inv_t + gnoise[t], axis=-1)
        x = jnp.dot(probs.astype(bf16), emb_bf,
                    preferred_element_type=f32).astype(bf16)
    outputs = jnp.concatenate([h0[None], jnp.stack(outs)], axis=0)
    return outputs, jnp.stack(preds)


if __name__ == "__main__":
    # Small, deterministic synthetic configuration.
    B = 2                       # batch
    dim_y, dim_z = 8, 24
    H = dim_y + dim_z           # GRU hidden = 32
    E = 32                      # embedding dim
    V = 128                     # vocab (num_embeddings)
    bos_id = 5                  # synthetic BOS (real one is 8002, outside small vocab)
    temperature = 0.5
    max_src_len = 8             # -> 7 recurrent steps

    key = jax.random.PRNGKey(0)
    ks = jax.random.split(key, 12)
    s = 0.1
    params = {
        "embed_weight": s * jax.random.normal(ks[0], (V, E), jnp.float32),
        "fc_w": s * jax.random.normal(ks[1], (dim_y, 1), jnp.float32),
        "fc_b": s * jax.random.normal(ks[2], (dim_y,), jnp.float32),
        "w_ih": s * jax.random.normal(ks[3], (3 * H, E), jnp.float32),
        "w_hh": s * jax.random.normal(ks[4], (3 * H, H), jnp.float32),
        "b_ih": s * jax.random.normal(ks[5], (3 * H,), jnp.float32),
        "b_hh": s * jax.random.normal(ks[6], (3 * H,), jnp.float32),
        "w_out": s * jax.random.normal(ks[7], (V, H), jnp.float32),
        "b_out": s * jax.random.normal(ks[8], (V,), jnp.float32),
        "bos_token_id": bos_id,
    }

    z = jax.random.normal(ks[9], (B, dim_z), jnp.float32)
    labels = jnp.array([0.0, 1.0], dtype=jnp.float32)
    src_len = np.array([max_src_len, max_src_len - 2], dtype=np.int32)
    gumbel_key = ks[10]

    outputs, predictions, gnoise, h0, x0 = generator_forward(
        z, labels, src_len, params, temperature=temperature,
        use_gumbel=True, gumbel_key=gumbel_key)
    jax.block_until_ready((outputs, predictions))

    # Correctness check against the pure-JAX reference (same bf16 matmul recipe;
    # tolerance covers pl.reciprocal(approx=True) in the kernel's softmax).
    ops = _prep_operands(params)
    ref_out, ref_pred = _reference_forward(h0, x0, ops, gnoise, temperature)
    np.testing.assert_allclose(np.asarray(outputs), np.asarray(ref_out),
                               rtol=2e-2, atol=2e-2)
    np.testing.assert_allclose(np.asarray(predictions), np.asarray(ref_pred),
                               rtol=2e-2, atol=2e-2)

    assert outputs.shape == (max_src_len, B, H)
    assert predictions.shape == (max_src_len - 1, B, V)
    print("KERNEL_OK")
</pallas_src>

<mosaic_0001>
module attributes {stable_mosaic.version = 11 : i64} {
  func.func @_gru_generator_kernel(%arg0: memref<2x32xf32, #tpu.memory_space<vmem>>, %arg1: memref<2x32xbf16, #tpu.memory_space<vmem>>, %arg2: memref<3x32x32xbf16, #tpu.memory_space<vmem>>, %arg3: memref<3x32x32xbf16, #tpu.memory_space<vmem>>, %arg4: memref<2x1x32xf32, #tpu.memory_space<vmem>>, %arg5: memref<1x32xf32, #tpu.memory_space<vmem>>, %arg6: memref<1x32xf32, #tpu.memory_space<vmem>>, %arg7: memref<32x128xbf16, #tpu.memory_space<vmem>>, %arg8: memref<1x128xf32, #tpu.memory_space<vmem>>, %arg9: memref<128x32xbf16, #tpu.memory_space<vmem>>, %arg10: memref<7x2x128xf32, #tpu.memory_space<vmem>>, %arg11: memref<7x2x32xf32, #tpu.memory_space<vmem>>, %arg12: memref<7x2x128xf32, #tpu.memory_space<vmem>>) attributes {dimension_semantics = [], scalar_prefetch = 0 : i64, scratch_operands = 0 : i64, tpu.core_type = #tpu.core_type<tc>} {
    %c0 = arith.constant 0 : index
    %c0_0 = arith.constant 0 : index
    %c0_1 = arith.constant 0 : index
    %0 = vector.load %arg2[%c0, %c0_0, %c0_1] : memref<3x32x32xbf16, #tpu.memory_space<vmem>>, vector<1x32x32xbf16>
    %1 = vector.shape_cast %0 : vector<1x32x32xbf16> to vector<32x32xbf16>
    %c1 = arith.constant 1 : index
    %c0_2 = arith.constant 0 : index
    %c0_3 = arith.constant 0 : index
    %2 = vector.load %arg2[%c1, %c0_2, %c0_3] : memref<3x32x32xbf16, #tpu.memory_space<vmem>>, vector<1x32x32xbf16>
    %3 = vector.shape_cast %2 : vector<1x32x32xbf16> to vector<32x32xbf16>
    %c2 = arith.constant 2 : index
    %c0_4 = arith.constant 0 : index
    %c0_5 = arith.constant 0 : index
    %4 = vector.load %arg2[%c2, %c0_4, %c0_5] : memref<3x32x32xbf16, #tpu.memory_space<vmem>>, vector<1x32x32xbf16>
    %5 = vector.shape_cast %4 : vector<1x32x32xbf16> to vector<32x32xbf16>
    %c0_6 = arith.constant 0 : index
    %c0_7 = arith.constant 0 : index
    %c0_8 = arith.constant 0 : index
    %6 = vector.load %arg3[%c0_6, %c0_7, %c0_8] : memref<3x32x32xbf16, #tpu.memory_space<vmem>>, vector<1x32x32xbf16>
    %7 = vector.shape_cast %6 : vector<1x32x32xbf16> to vector<32x32xbf16>
    %c1_9 = arith.constant 1 : index
    %c0_10 = arith.constant 0 : index
    %c0_11 = arith.constant 0 : index
    %8 = vector.load %arg3[%c1_9, %c0_10, %c0_11] : memref<3x32x32xbf16, #tpu.memory_space<vmem>>, vector<1x32x32xbf16>
    %9 = vector.shape_cast %8 : vector<1x32x32xbf16> to vector<32x32xbf16>
    %c2_12 = arith.constant 2 : index
    %c0_13 = arith.constant 0 : index
    %c0_14 = arith.constant 0 : index
    %10 = vector.load %arg3[%c2_12, %c0_13, %c0_14] : memref<3x32x32xbf16, #tpu.memory_space<vmem>>, vector<1x32x32xbf16>
    %11 = vector.shape_cast %10 : vector<1x32x32xbf16> to vector<32x32xbf16>
    %c0_15 = arith.constant 0 : index
    %c0_16 = arith.constant 0 : index
    %c0_17 = arith.constant 0 : index
    %12 = vector.load %arg4[%c0_15, %c0_16, %c0_17] : memref<2x1x32xf32, #tpu.memory_space<vmem>>, vector<1x1x32xf32>
    %13 = vector.shape_cast %12 : vector<1x1x32xf32> to vector<1x32xf32>
    %c1_18 = arith.constant 1 : index
    %c0_19 = arith.constant 0 : index
    %c0_20 = arith.constant 0 : index
    %14 = vector.load %arg4[%c1_18, %c0_19, %c0_20] : memref<2x1x32xf32, #tpu.memory_space<vmem>>, vector<1x1x32xf32>
    %15 = vector.shape_cast %14 : vector<1x1x32xf32> to vector<1x32xf32>
    %c0_21 = arith.constant 0 : index
    %c0_22 = arith.constant 0 : index
    %16 = vector.load %arg5[%c0_21, %c0_22] : memref<1x32xf32, #tpu.memory_space<vmem>>, vector<1x32xf32>
    %c0_23 = arith.constant 0 : index
    %c0_24 = arith.constant 0 : index
    %17 = vector.load %arg6[%c0_23, %c0_24] : memref<1x32xf32, #tpu.memory_space<vmem>>, vector<1x32xf32>
    %c0_25 = arith.constant 0 : index
    %c0_26 = arith.constant 0 : index
    %18 = vector.load %arg7[%c0_25, %c0_26] : memref<32x128xbf16, #tpu.memory_space<vmem>>, vector<32x128xbf16>
    %c0_27 = arith.constant 0 : index
    %c0_28 = arith.constant 0 : index
    %19 = vector.load %arg8[%c0_27, %c0_28] : memref<1x128xf32, #tpu.memory_space<vmem>>, vector<1x128xf32>
    %c0_29 = arith.constant 0 : index
    %c0_30 = arith.constant 0 : index
    %20 = vector.load %arg9[%c0_29, %c0_30] : memref<128x32xbf16, #tpu.memory_space<vmem>>, vector<128x32xbf16>
    %c0_31 = arith.constant 0 : index
    %c0_32 = arith.constant 0 : index
    %21 = vector.load %arg0[%c0_31, %c0_32] : memref<2x32xf32, #tpu.memory_space<vmem>>, vector<2x32xf32>
    %c0_33 = arith.constant 0 : index
    %c0_34 = arith.constant 0 : index
    %22 = vector.load %arg1[%c0_33, %c0_34] : memref<2x32xbf16, #tpu.memory_space<vmem>>, vector<2x32xbf16>
    %c0_i32 = arith.constant 0 : i32
    %23 = arith.truncf %21 : vector<2x32xf32> to vector<2x32xbf16>
    %cst = arith.constant dense<0.000000e+00> : vector<2x32xf32>
    %24 = tpu.matmul %22, %1, %cst {dimension_numbers = #tpu.dot_dimension_numbers<[1], [0], [0], [1], [0, 0, 1, 1], [], []>} : vector<2x32xbf16>, vector<32x32xbf16>, vector<2x32xf32> -> vector<2x32xf32>
    %cst_35 = arith.constant dense<0.000000e+00> : vector<2x32xf32>
    %25 = tpu.matmul %23, %7, %cst_35 {dimension_numbers = #tpu.dot_dimension_numbers<[1], [0], [0], [1], [0, 0, 1, 1], [], []>} : vector<2x32xbf16>, vector<32x32xbf16>, vector<2x32xf32> -> vector<2x32xf32>
    %26 = arith.addf %24, %25 : vector<2x32xf32>
    %27 = vector.broadcast %13 : vector<1x32xf32> to vector<2x32xf32>
    %28 = arith.addf %26, %27 : vector<2x32xf32>
    %29 = arith.negf %28 : vector<2x32xf32>
    %30 = math.exp %29 : vector<2x32xf32>
    %cst_36 = arith.constant 1.000000e+00 : f32
    %31 = vector.broadcast %cst_36 : f32 to vector<2x32xf32>
    %32 = arith.addf %31, %30 : vector<2x32xf32>
    %33 = arith.divf %31, %32 : vector<2x32xf32>
    %cst_37 = arith.constant dense<0.000000e+00> : vector<2x32xf32>
    %34 = tpu.matmul %22, %3, %cst_37 {dimension_numbers = #tpu.dot_dimension_numbers<[1], [0], [0], [1], [0, 0, 1, 1], [], []>} : vector<2x32xbf16>, vector<32x32xbf16>, vector<2x32xf32> -> vector<2x32xf32>
    %cst_38 = arith.constant dense<0.000000e+00> : vector<2x32xf32>
    %35 = tpu.matmul %23, %9, %cst_38 {dimension_numbers = #tpu.dot_dimension_numbers<[1], [0], [0], [1], [0, 0, 1, 1], [], []>} : vector<2x32xbf16>, vector<32x32xbf16>, vector<2x32xf32> -> vector<2x32xf32>
    %36 = arith.addf %34, %35 : vector<2x32xf32>
    %37 = vector.broadcast %15 : vector<1x32xf32> to vector<2x32xf32>
    %38 = arith.addf %36, %37 : vector<2x32xf32>
    %39 = arith.negf %38 : vector<2x32xf32>
    %40 = math.exp %39 : vector<2x32xf32>
    %cst_39 = arith.constant 1.000000e+00 : f32
    %41 = vector.broadcast %cst_39 : f32 to vector<2x32xf32>
    %42 = arith.addf %41, %40 : vector<2x32xf32>
    %43 = arith.divf %41, %42 : vector<2x32xf32>
    %cst_40 = arith.constant dense<0.000000e+00> : vector<2x32xf32>
    %44 = tpu.matmul %22, %5, %cst_40 {dimension_numbers = #tpu.dot_dimension_numbers<[1], [0], [0], [1], [0, 0, 1, 1], [], []>} : vector<2x32xbf16>, vector<32x32xbf16>, vector<2x32xf32> -> vector<2x32xf32>
    %45 = vector.broadcast %16 : vector<1x32xf32> to vector<2x32xf32>
    %46 = arith.addf %44, %45 : vector<2x32xf32>
    %cst_41 = arith.constant dense<0.000000e+00> : vector<2x32xf32>
    %47 = tpu.matmul %23, %11, %cst_41 {dimension_numbers = #tpu.dot_dimension_numbers<[1], [0], [0], [1], [0, 0, 1, 1], [], []>} : vector<2x32xbf16>, vector<32x32xbf16>, vector<2x32xf32> -> vector<2x32xf32>
    %48 = vector.broadcast %17 : vector<1x32xf32> to vector<2x32xf32>
    %49 = arith.addf %47, %48 : vector<2x32xf32>
    %50 = arith.mulf %33, %49 : vector<2x32xf32>
    %51 = arith.addf %46, %50 : vector<2x32xf32>
    %52 = math.tanh %51 : vector<2x32xf32>
    %cst_42 = arith.constant 1.000000e+00 : f32
    %53 = vector.broadcast %cst_42 : f32 to vector<2x32xf32>
    %54 = arith.subf %53, %43 : vector<2x32xf32>
    %55 = arith.mulf %54, %52 : vector<2x32xf32>
    %56 = arith.mulf %43, %21 : vector<2x32xf32>
    %57 = arith.addf %55, %56 : vector<2x32xf32>
    %58 = arith.truncf %57 : vector<2x32xf32> to vector<2x32xbf16>
    %cst_43 = arith.constant dense<0.000000e+00> : vector<2x128xf32>
    %59 = tpu.matmul %58, %18, %cst_43 {dimension_numbers = #tpu.dot_dimension_numbers<[1], [0], [0], [1], [0, 0, 1, 1], [], []>} : vector<2x32xbf16>, vector<32x128xbf16>, vector<2x128xf32> -> vector<2x128xf32>
    %60 = vector.broadcast %19 : vector<1x128xf32> to vector<2x128xf32>
    %61 = arith.addf %59, %60 : vector<2x128xf32>
    %62 = arith.index_cast %c0_i32 : i32 to index
    %c0_44 = arith.constant 0 : index
    %c0_45 = arith.constant 0 : index
    %63 = vector.load %arg11[%62, %c0_44, %c0_45] : memref<7x2x32xf32, #tpu.memory_space<vmem>>, vector<1x2x32xf32>
    %64 = vector.shape_cast %63 : vector<1x2x32xf32> to vector<2x32xf32>
    %65 = vector.shape_cast %57 : vector<2x32xf32> to vector<1x2x32xf32>
    tpu.vector_store %arg11[%62, %c0_44, %c0_45], %65 {strides = array<i32>} : memref<7x2x32xf32, #tpu.memory_space<vmem>>, vector<1x2x32xf32>,
    %66 = arith.index_cast %c0_i32 : i32 to index
    %c0_46 = arith.constant 0 : index
    %c0_47 = arith.constant 0 : index
    %67 = vector.load %arg12[%66, %c0_46, %c0_47] : memref<7x2x128xf32, #tpu.memory_space<vmem>>, vector<1x2x128xf32>
    %68 = vector.shape_cast %67 : vector<1x2x128xf32> to vector<2x128xf32>
    %69 = vector.shape_cast %61 : vector<2x128xf32> to vector<1x2x128xf32>
    tpu.vector_store %arg12[%66, %c0_46, %c0_47], %69 {strides = array<i32>} : memref<7x2x128xf32, #tpu.memory_space<vmem>>, vector<1x2x128xf32>,
    %cst_48 = arith.constant 2.000000e+00 : f32
    %70 = vector.broadcast %cst_48 : f32 to vector<2x128xf32>
    %71 = arith.mulf %61, %70 : vector<2x128xf32>
    %72 = arith.index_cast %c0_i32 : i32 to index
    %c0_49 = arith.constant 0 : index
    %c0_50 = arith.constant 0 : index
    %73 = vector.load %arg10[%72, %c0_49, %c0_50] : memref<7x2x128xf32, #tpu.memory_space<vmem>>, vector<1x2x128xf32>
    %74 = vector.shape_cast %73 : vector<1x2x128xf32> to vector<2x128xf32>
    %75 = arith.addf %71, %74 : vector<2x128xf32>
    %cst_51 = arith.constant dense<0xFF800000> : vector<2xf32>
    %76 = vector.multi_reduction <maximumf>, %75, %cst_51 [1] : vector<2x128xf32> to vector<2xf32>
    %77 = vector.shape_cast %76 : vector<2xf32> to vector<2x1xf32>
    %78 = vector.broadcast %77 : vector<2x1xf32> to vector<2x128xf32>
    %79 = arith.subf %75, %78 : vector<2x128xf32>
    %80 = math.exp %79 : vector<2x128xf32>
    %cst_52 = arith.constant dense<0.000000e+00> : vector<2xf32>
    %81 = vector.multi_reduction <add>, %80, %cst_52 [1] : vector<2x128xf32> to vector<2xf32>
    %82 = vector.shape_cast %81 : vector<2xf32> to vector<2x1xf32>
    %83 = tpu.reciprocal %82 {approx = true} : vector<2x1xf32> -> vector<2x1xf32>
    %84 = vector.broadcast %83 : vector<2x1xf32> to vector<2x128xf32>
    %85 = arith.mulf %80, %84 : vector<2x128xf32>
    %86 = arith.truncf %85 : vector<2x128xf32> to vector<2x128xbf16>
    %cst_53 = arith.constant dense<0.000000e+00> : vector<2x32xf32>
    %87 = tpu.matmul %86, %20, %cst_53 {dimension_numbers = #tpu.dot_dimension_numbers<[1], [0], [0], [1], [0, 0, 1, 1], [], []>} : vector<2x128xbf16>, vector<128x32xbf16>, vector<2x32xf32> -> vector<2x32xf32>
    %88 = arith.truncf %87 : vector<2x32xf32> to vector<2x32xbf16>
    %c1_i32 = arith.constant 1 : i32
    %89 = arith.truncf %57 : vector<2x32xf32> to vector<2x32xbf16>
    %cst_54 = arith.constant dense<0.000000e+00> : vector<2x32xf32>
    %90 = tpu.matmul %88, %1, %cst_54 {dimension_numbers = #tpu.dot_dimension_numbers<[1], [0], [0], [1], [0, 0, 1, 1], [], []>} : vector<2x32xbf16>, vector<32x32xbf16>, vector<2x32xf32> -> vector<2x32xf32>
    %cst_55 = arith.constant dense<0.000000e+00> : vector<2x32xf32>
    %91 = tpu.matmul %89, %7, %cst_55 {dimension_numbers = #tpu.dot_dimension_numbers<[1], [0], [0], [1], [0, 0, 1, 1], [], []>} : vector<2x32xbf16>, vector<32x32xbf16>, vector<2x32xf32> -> vector<2x32xf32>
    %92 = arith.addf %90, %91 : vector<2x32xf32>
    %93 = vector.broadcast %13 : vector<1x32xf32> to vector<2x32xf32>
    %94 = arith.addf %92, %93 : vector<2x32xf32>
    %95 = arith.negf %94 : vector<2x32xf32>
    %96 = math.exp %95 : vector<2x32xf32>
    %cst_56 = arith.constant 1.000000e+00 : f32
    %97 = vector.broadcast %cst_56 : f32 to vector<2x32xf32>
    %98 = arith.addf %97, %96 : vector<2x32xf32>
    %99 = arith.divf %97, %98 : vector<2x32xf32>
    %cst_57 = arith.constant dense<0.000000e+00> : vector<2x32xf32>
    %100 = tpu.matmul %88, %3, %cst_57 {dimension_numbers = #tpu.dot_dimension_numbers<[1], [0], [0], [1], [0, 0, 1, 1], [], []>} : vector<2x32xbf16>, vector<32x32xbf16>, vector<2x32xf32> -> vector<2x32xf32>
    %cst_58 = arith.constant dense<0.000000e+00> : vector<2x32xf32>
    %101 = tpu.matmul %89, %9, %cst_58 {dimension_numbers = #tpu.dot_dimension_numbers<[1], [0], [0], [1], [0, 0, 1, 1], [], []>} : vector<2x32xbf16>, vector<32x32xbf16>, vector<2x32xf32> -> vector<2x32xf32>
    %102 = arith.addf %100, %101 : vector<2x32xf32>
    %103 = vector.broadcast %15 : vector<1x32xf32> to vector<2x32xf32>
    %104 = arith.addf %102, %103 : vector<2x32xf32>
    %105 = arith.negf %104 : vector<2x32xf32>
    %106 = math.exp %105 : vector<2x32xf32>
    %cst_59 = arith.constant 1.000000e+00 : f32
    %107 = vector.broadcast %cst_59 : f32 to vector<2x32xf32>
    %108 = arith.addf %107, %106 : vector<2x32xf32>
    %109 = arith.divf %107, %108 : vector<2x32xf32>
    %cst_60 = arith.constant dense<0.000000e+00> : vector<2x32xf32>
    %110 = tpu.matmul %88, %5, %cst_60 {dimension_numbers = #tpu.dot_dimension_numbers<[1], [0], [0], [1], [0, 0, 1, 1], [], []>} : vector<2x32xbf16>, vector<32x32xbf16>, vector<2x32xf32> -> vector<2x32xf32>
    %111 = vector.broadcast %16 : vector<1x32xf32> to vector<2x32xf32>
    %112 = arith.addf %110, %111 : vector<2x32xf32>
    %cst_61 = arith.constant dense<0.000000e+00> : vector<2x32xf32>
    %113 = tpu.matmul %89, %11, %cst_61 {dimension_numbers = #tpu.dot_dimension_numbers<[1], [0], [0], [1], [0, 0, 1, 1], [], []>} : vector<2x32xbf16>, vector<32x32xbf16>, vector<2x32xf32> -> vector<2x32xf32>
    %114 = vector.broadcast %17 : vector<1x32xf32> to vector<2x32xf32>
    %115 = arith.addf %113, %114 : vector<2x32xf32>
    %116 = arith.mulf %99, %115 : vector<2x32xf32>
    %117 = arith.addf %112, %116 : vector<2x32xf32>
    %118 = math.tanh %117 : vector<2x32xf32>
    %cst_62 = arith.constant 1.000000e+00 : f32
    %119 = vector.broadcast %cst_62 : f32 to vector<2x32xf32>
    %120 = arith.subf %119, %109 : vector<2x32xf32>
    %121 = arith.mulf %120, %118 : vector<2x32xf32>
    %122 = arith.mulf %109, %57 : vector<2x32xf32>
    %123 = arith.addf %121, %122 : vector<2x32xf32>
    %124 = arith.truncf %123 : vector<2x32xf32> to vector<2x32xbf16>
    %cst_63 = arith.constant dense<0.000000e+00> : vector<2x128xf32>
    %125 = tpu.matmul %124, %18, %cst_63 {dimension_numbers = #tpu.dot_dimension_numbers<[1], [0], [0], [1], [0, 0, 1, 1], [], []>} : vector<2x32xbf16>, vector<32x128xbf16>, vector<2x128xf32> -> vector<2x128xf32>
    %126 = vector.broadcast %19 : vector<1x128xf32> to vector<2x128xf32>
    %127 = arith.addf %125, %126 : vector<2x128xf32>
    %128 = arith.index_cast %c1_i32 : i32 to index
    %c0_64 = arith.constant 0 : index
    %c0_65 = arith.constant 0 : index
    %129 = vector.load %arg11[%128, %c0_64, %c0_65] : memref<7x2x32xf32, #tpu.memory_space<vmem>>, vector<1x2x32xf32>
    %130 = vector.shape_cast %129 : vector<1x2x32xf32> to vector<2x32xf32>
    %131 = vector.shape_cast %123 : vector<2x32xf32> to vector<1x2x32xf32>
    tpu.vector_store %arg11[%128, %c0_64, %c0_65], %131 {strides = array<i32>} : memref<7x2x32xf32, #tpu.memory_space<vmem>>, vector<1x2x32xf32>,
    %132 = arith.index_cast %c1_i32 : i32 to index
    %c0_66 = arith.constant 0 : index
    %c0_67 = arith.constant 0 : index
    %133 = vector.load %arg12[%132, %c0_66, %c0_67] : memref<7x2x128xf32, #tpu.memory_space<vmem>>, vector<1x2x128xf32>
    %134 = vector.shape_cast %133 : vector<1x2x128xf32> to vector<2x128xf32>
    %135 = vector.shape_cast %127 : vector<2x128xf32> to vector<1x2x128xf32>
    tpu.vector_store %arg12[%132, %c0_66, %c0_67], %135 {strides = array<i32>} : memref<7x2x128xf32, #tpu.memory_space<vmem>>, vector<1x2x128xf32>,
    %cst_68 = arith.constant 2.000000e+00 : f32
    %136 = vector.broadcast %cst_68 : f32 to vector<2x128xf32>
    %137 = arith.mulf %127, %136 : vector<2x128xf32>
    %138 = arith.index_cast %c1_i32 : i32 to index
    %c0_69 = arith.constant 0 : index
    %c0_70 = arith.constant 0 : index
    %139 = vector.load %arg10[%138, %c0_69, %c0_70] : memref<7x2x128xf32, #tpu.memory_space<vmem>>, vector<1x2x128xf32>
    %140 = vector.shape_cast %139 : vector<1x2x128xf32> to vector<2x128xf32>
    %141 = arith.addf %137, %140 : vector<2x128xf32>
    %cst_71 = arith.constant dense<0xFF800000> : vector<2xf32>
    %142 = vector.multi_reduction <maximumf>, %141, %cst_71 [1] : vector<2x128xf32> to vector<2xf32>
    %143 = vector.shape_cast %142 : vector<2xf32> to vector<2x1xf32>
    %144 = vector.broadcast %143 : vector<2x1xf32> to vector<2x128xf32>
    %145 = arith.subf %141, %144 : vector<2x128xf32>
    %146 = math.exp %145 : vector<2x128xf32>
    %cst_72 = arith.constant dense<0.000000e+00> : vector<2xf32>
    %147 = vector.multi_reduction <add>, %146, %cst_72 [1] : vector<2x128xf32> to vector<2xf32>
    %148 = vector.shape_cast %147 : vector<2xf32> to vector<2x1xf32>
    %149 = tpu.reciprocal %148 {approx = true} : vector<2x1xf32> -> vector<2x1xf32>
    %150 = vector.broadcast %149 : vector<2x1xf32> to vector<2x128xf32>
    %151 = arith.mulf %146, %150 : vector<2x128xf32>
    %152 = arith.truncf %151 : vector<2x128xf32> to vector<2x128xbf16>
    %cst_73 = arith.constant dense<0.000000e+00> : vector<2x32xf32>
    %153 = tpu.matmul %152, %20, %cst_73 {dimension_numbers = #tpu.dot_dimension_numbers<[1], [0], [0], [1], [0, 0, 1, 1], [], []>} : vector<2x128xbf16>, vector<128x32xbf16>, vector<2x32xf32> -> vector<2x32xf32>
    %154 = arith.truncf %153 : vector<2x32xf32> to vector<2x32xbf16>
    %c2_i32 = arith.constant 2 : i32
    %155 = arith.truncf %123 : vector<2x32xf32> to vector<2x32xbf16>
    %cst_74 = arith.constant dense<0.000000e+00> : vector<2x32xf32>
    %156 = tpu.matmul %154, %1, %cst_74 {dimension_numbers = #tpu.dot_dimension_numbers<[1], [0], [0], [1], [0, 0, 1, 1], [], []>} : vector<2x32xbf16>, vector<32x32xbf16>, vector<2x32xf32> -> vector<2x32xf32>
    %cst_75 = arith.constant dense<0.000000e+00> : vector<2x32xf32>
    %157 = tpu.matmul %155, %7, %cst_75 {dimension_numbers = #tpu.dot_dimension_numbers<[1], [0], [0], [1], [0, 0, 1, 1], [], []>} : vector<2x32xbf16>, vector<32x32xbf16>, vector<2x32xf32> -> vector<2x32xf32>
    %158 = arith.addf %156, %157 : vector<2x32xf32>
    %159 = vector.broadcast %13 : vector<1x32xf32> to vector<2x32xf32>
    %160 = arith.addf %158, %159 : vector<2x32xf32>
    %161 = arith.negf %160 : vector<2x32xf32>
    %162 = math.exp %161 : vector<2x32xf32>
    %cst_76 = arith.constant 1.000000e+00 : f32
    %163 = vector.broadcast %cst_76 : f32 to vector<2x32xf32>
    %164 = arith.addf %163, %162 : vector<2x32xf32>
    %165 = arith.divf %163, %164 : vector<2x32xf32>
    %cst_77 = arith.constant dense<0.000000e+00> : vector<2x32xf32>
    %166 = tpu.matmul %154, %3, %cst_77 {dimension_numbers = #tpu.dot_dimension_numbers<[1], [0], [0], [1], [0, 0, 1, 1], [], []>} : vector<2x32xbf16>, vector<32x32xbf16>, vector<2x32xf32> -> vector<2x32xf32>
    %cst_78 = arith.constant dense<0.000000e+00> : vector<2x32xf32>
    %167 = tpu.matmul %155, %9, %cst_78 {dimension_numbers = #tpu.dot_dimension_numbers<[1], [0], [0], [1], [0, 0, 1, 1], [], []>} : vector<2x32xbf16>, vector<32x32xbf16>, vector<2x32xf32> -> vector<2x32xf32>
    %168 = arith.addf %166, %167 : vector<2x32xf32>
    %169 = vector.broadcast %15 : vector<1x32xf32> to vector<2x32xf32>
    %170 = arith.addf %168, %169 : vector<2x32xf32>
    %171 = arith.negf %170 : vector<2x32xf32>
    %172 = math.exp %171 : vector<2x32xf32>
    %cst_79 = arith.constant 1.000000e+00 : f32
    %173 = vector.broadcast %cst_79 : f32 to vector<2x32xf32>
    %174 = arith.addf %173, %172 : vector<2x32xf32>
    %175 = arith.divf %173, %174 : vector<2x32xf32>
    %cst_80 = arith.constant dense<0.000000e+00> : vector<2x32xf32>
    %176 = tpu.matmul %154, %5, %cst_80 {dimension_numbers = #tpu.dot_dimension_numbers<[1], [0], [0], [1], [0, 0, 1, 1], [], []>} : vector<2x32xbf16>, vector<32x32xbf16>, vector<2x32xf32> -> vector<2x32xf32>
    %177 = vector.broadcast %16 : vector<1x32xf32> to vector<2x32xf32>
    %178 = arith.addf %176, %177 : vector<2x32xf32>
    %cst_81 = arith.constant dense<0.000000e+00> : vector<2x32xf32>
    %179 = tpu.matmul %155, %11, %cst_81 {dimension_numbers = #tpu.dot_dimension_numbers<[1], [0], [0], [1], [0, 0, 1, 1], [], []>} : vector<2x32xbf16>, vector<32x32xbf16>, vector<2x32xf32> -> vector<2x32xf32>
    %180 = vector.broadcast %17 : vector<1x32xf32> to vector<2x32xf32>
    %181 = arith.addf %179, %180 : vector<2x32xf32>
    %182 = arith.mulf %165, %181 : vector<2x32xf32>
    %183 = arith.addf %178, %182 : vector<2x32xf32>
    %184 = math.tanh %183 : vector<2x32xf32>
    %cst_82 = arith.constant 1.000000e+00 : f32
    %185 = vector.broadcast %cst_82 : f32 to vector<2x32xf32>
    %186 = arith.subf %185, %175 : vector<2x32xf32>
    %187 = arith.mulf %186, %184 : vector<2x32xf32>
    %188 = arith.mulf %175, %123 : vector<2x32xf32>
    %189 = arith.addf %187, %188 : vector<2x32xf32>
    %190 = arith.truncf %189 : vector<2x32xf32> to vector<2x32xbf16>
    %cst_83 = arith.constant dense<0.000000e+00> : vector<2x128xf32>
    %191 = tpu.matmul %190, %18, %cst_83 {dimension_numbers = #tpu.dot_dimension_numbers<[1], [0], [0], [1], [0, 0, 1, 1], [], []>} : vector<2x32xbf16>, vector<32x128xbf16>, vector<2x128xf32> -> vector<2x128xf32>
    %192 = vector.broadcast %19 : vector<1x128xf32> to vector<2x128xf32>
    %193 = arith.addf %191, %192 : vector<2x128xf32>
    %194 = arith.index_cast %c2_i32 : i32 to index
    %c0_84 = arith.constant 0 : index
    %c0_85 = arith.constant 0 : index
    %195 = vector.load %arg11[%194, %c0_84, %c0_85] : memref<7x2x32xf32, #tpu.memory_space<vmem>>, vector<1x2x32xf32>
    %196 = vector.shape_cast %195 : vector<1x2x32xf32> to vector<2x32xf32>
    %197 = vector.shape_cast %189 : vector<2x32xf32> to vector<1x2x32xf32>
    tpu.vector_store %arg11[%194, %c0_84, %c0_85], %197 {strides = array<i32>} : memref<7x2x32xf32, #tpu.memory_space<vmem>>, vector<1x2x32xf32>,
    %198 = arith.index_cast %c2_i32 : i32 to index
    %c0_86 = arith.constant 0 : index
    %c0_87 = arith.constant 0 : index
    %199 = vector.load %arg12[%198, %c0_86, %c0_87] : memref<7x2x128xf32, #tpu.memory_space<vmem>>, vector<1x2x128xf32>
    %200 = vector.shape_cast %199 : vector<1x2x128xf32> to vector<2x128xf32>
    %201 = vector.shape_cast %193 : vector<2x128xf32> to vector<1x2x128xf32>
    tpu.vector_store %arg12[%198, %c0_86, %c0_87], %201 {strides = array<i32>} : memref<7x2x128xf32, #tpu.memory_space<vmem>>, vector<1x2x128xf32>,
    %cst_88 = arith.constant 2.000000e+00 : f32
    %202 = vector.broadcast %cst_88 : f32 to vector<2x128xf32>
    %203 = arith.mulf %193, %202 : vector<2x128xf32>
    %204 = arith.index_cast %c2_i32 : i32 to index
    %c0_89 = arith.constant 0 : index
    %c0_90 = arith.constant 0 : index
    %205 = vector.load %arg10[%204, %c0_89, %c0_90] : memref<7x2x128xf32, #tpu.memory_space<vmem>>, vector<1x2x128xf32>
    %206 = vector.shape_cast %205 : vector<1x2x128xf32> to vector<2x128xf32>
    %207 = arith.addf %203, %206 : vector<2x128xf32>
    %cst_91 = arith.constant dense<0xFF800000> : vector<2xf32>
    %208 = vector.multi_reduction <maximumf>, %207, %cst_91 [1] : vector<2x128xf32> to vector<2xf32>
    %209 = vector.shape_cast %208 : vector<2xf32> to vector<2x1xf32>
    %210 = vector.broadcast %209 : vector<2x1xf32> to vector<2x128xf32>
    %211 = arith.subf %207, %210 : vector<2x128xf32>
    %212 = math.exp %211 : vector<2x128xf32>
    %cst_92 = arith.constant dense<0.000000e+00> : vector<2xf32>
    %213 = vector.multi_reduction <add>, %212, %cst_92 [1] : vector<2x128xf32> to vector<2xf32>
    %214 = vector.shape_cast %213 : vector<2xf32> to vector<2x1xf32>
    %215 = tpu.reciprocal %214 {approx = true} : vector<2x1xf32> -> vector<2x1xf32>
    %216 = vector.broadcast %215 : vector<2x1xf32> to vector<2x128xf32>
    %217 = arith.mulf %212, %216 : vector<2x128xf32>
    %218 = arith.truncf %217 : vector<2x128xf32> to vector<2x128xbf16>
    %cst_93 = arith.constant dense<0.000000e+00> : vector<2x32xf32>
    %219 = tpu.matmul %218, %20, %cst_93 {dimension_numbers = #tpu.dot_dimension_numbers<[1], [0], [0], [1], [0, 0, 1, 1], [], []>} : vector<2x128xbf16>, vector<128x32xbf16>, vector<2x32xf32> -> vector<2x32xf32>
    %220 = arith.truncf %219 : vector<2x32xf32> to vector<2x32xbf16>
    %c3_i32 = arith.constant 3 : i32
    %221 = arith.truncf %189 : vector<2x32xf32> to vector<2x32xbf16>
    %cst_94 = arith.constant dense<0.000000e+00> : vector<2x32xf32>
    %222 = tpu.matmul %220, %1, %cst_94 {dimension_numbers = #tpu.dot_dimension_numbers<[1], [0], [0], [1], [0, 0, 1, 1], [], []>} : vector<2x32xbf16>, vector<32x32xbf16>, vector<2x32xf32> -> vector<2x32xf32>
    %cst_95 = arith.constant dense<0.000000e+00> : vector<2x32xf32>
    %223 = tpu.matmul %221, %7, %cst_95 {dimension_numbers = #tpu.dot_dimension_numbers<[1], [0], [0], [1], [0, 0, 1, 1], [], []>} : vector<2x32xbf16>, vector<32x32xbf16>, vector<2x32xf32> -> vector<2x32xf32>
    %224 = arith.addf %222, %223 : vector<2x32xf32>
    %225 = vector.broadcast %13 : vector<1x32xf32> to vector<2x32xf32>
    %226 = arith.addf %224, %225 : vector<2x32xf32>
    %227 = arith.negf %226 : vector<2x32xf32>
    %228 = math.exp %227 : vector<2x32xf32>
    %cst_96 = arith.constant 1.000000e+00 : f32
    %229 = vector.broadcast %cst_96 : f32 to vector<2x32xf32>
    %230 = arith.addf %229, %228 : vector<2x32xf32>
    %231 = arith.divf %229, %230 : vector<2x32xf32>
    %cst_97 = arith.constant dense<0.000000e+00> : vector<2x32xf32>
    %232 = tpu.matmul %220, %3, %cst_97 {dimension_numbers = #tpu.dot_dimension_numbers<[1], [0], [0], [1], [0, 0, 1, 1], [], []>} : vector<2x32xbf16>, vector<32x32xbf16>, vector<2x32xf32> -> vector<2x32xf32>
    %cst_98 = arith.constant dense<0.000000e+00> : vector<2x32xf32>
    %233 = tpu.matmul %221, %9, %cst_98 {dimension_numbers = #tpu.dot_dimension_numbers<[1], [0], [0], [1], [0, 0, 1, 1], [], []>} : vector<2x32xbf16>, vector<32x32xbf16>, vector<2x32xf32> -> vector<2x32xf32>
    %234 = arith.addf %232, %233 : vector<2x32xf32>
    %235 = vector.broadcast %15 : vector<1x32xf32> to vector<2x32xf32>
    %236 = arith.addf %234, %235 : vector<2x32xf32>
    %237 = arith.negf %236 : vector<2x32xf32>
    %238 = math.exp %237 : vector<2x32xf32>
    %cst_99 = arith.constant 1.000000e+00 : f32
    %239 = vector.broadcast %cst_99 : f32 to vector<2x32xf32>
    %240 = arith.addf %239, %238 : vector<2x32xf32>
    %241 = arith.divf %239, %240 : vector<2x32xf32>
    %cst_100 = arith.constant dense<0.000000e+00> : vector<2x32xf32>
    %242 = tpu.matmul %220, %5, %cst_100 {dimension_numbers = #tpu.dot_dimension_numbers<[1], [0], [0], [1], [0, 0, 1, 1], [], []>} : vector<2x32xbf16>, vector<32x32xbf16>, vector<2x32xf32> -> vector<2x32xf32>
    %243 = vector.broadcast %16 : vector<1x32xf32> to vector<2x32xf32>
    %244 = arith.addf %242, %243 : vector<2x32xf32>
    %cst_101 = arith.constant dense<0.000000e+00> : vector<2x32xf32>
    %245 = tpu.matmul %221, %11, %cst_101 {dimension_numbers = #tpu.dot_dimension_numbers<[1], [0], [0], [1], [0, 0, 1, 1], [], []>} : vector<2x32xbf16>, vector<32x32xbf16>, vector<2x32xf32> -> vector<2x32xf32>
    %246 = vector.broadcast %17 : vector<1x32xf32> to vector<2x32xf32>
    %247 = arith.addf %245, %246 : vector<2x32xf32>
    %248 = arith.mulf %231, %247 : vector<2x32xf32>
    %249 = arith.addf %244, %248 : vector<2x32xf32>
    %250 = math.tanh %249 : vector<2x32xf32>
    %cst_102 = arith.constant 1.000000e+00 : f32
    %251 = vector.broadcast %cst_102 : f32 to vector<2x32xf32>
    %252 = arith.subf %251, %241 : vector<2x32xf32>
    %253 = arith.mulf %252, %250 : vector<2x32xf32>
    %254 = arith.mulf %241, %189 : vector<2x32xf32>
    %255 = arith.addf %253, %254 : vector<2x32xf32>
    %256 = arith.truncf %255 : vector<2x32xf32> to vector<2x32xbf16>
    %cst_103 = arith.constant dense<0.000000e+00> : vector<2x128xf32>
    %257 = tpu.matmul %256, %18, %cst_103 {dimension_numbers = #tpu.dot_dimension_numbers<[1], [0], [0], [1], [0, 0, 1, 1], [], []>} : vector<2x32xbf16>, vector<32x128xbf16>, vector<2x128xf32> -> vector<2x128xf32>
    %258 = vector.broadcast %19 : vector<1x128xf32> to vector<2x128xf32>
    %259 = arith.addf %257, %258 : vector<2x128xf32>
    %260 = arith.index_cast %c3_i32 : i32 to index
    %c0_104 = arith.constant 0 : index
    %c0_105 = arith.constant 0 : index
    %261 = vector.load %arg11[%260, %c0_104, %c0_105] : memref<7x2x32xf32, #tpu.memory_space<vmem>>, vector<1x2x32xf32>
    %262 = vector.shape_cast %261 : vector<1x2x32xf32> to vector<2x32xf32>
    %263 = vector.shape_cast %255 : vector<2x32xf32> to vector<1x2x32xf32>
    tpu.vector_store %arg11[%260, %c0_104, %c0_105], %263 {strides = array<i32>} : memref<7x2x32xf32, #tpu.memory_space<vmem>>, vector<1x2x32xf32>,
    %264 = arith.index_cast %c3_i32 : i32 to index
    %c0_106 = arith.constant 0 : index
    %c0_107 = arith.constant 0 : index
    %265 = vector.load %arg12[%264, %c0_106, %c0_107] : memref<7x2x128xf32, #tpu.memory_space<vmem>>, vector<1x2x128xf32>
    %266 = vector.shape_cast %265 : vector<1x2x128xf32> to vector<2x128xf32>
    %267 = vector.shape_cast %259 : vector<2x128xf32> to vector<1x2x128xf32>
    tpu.vector_store %arg12[%264, %c0_106, %c0_107], %267 {strides = array<i32>} : memref<7x2x128xf32, #tpu.memory_space<vmem>>, vector<1x2x128xf32>,
    %cst_108 = arith.constant 2.000000e+00 : f32
    %268 = vector.broadcast %cst_108 : f32 to vector<2x128xf32>
    %269 = arith.mulf %259, %268 : vector<2x128xf32>
    %270 = arith.index_cast %c3_i32 : i32 to index
    %c0_109 = arith.constant 0 : index
    %c0_110 = arith.constant 0 : index
    %271 = vector.load %arg10[%270, %c0_109, %c0_110] : memref<7x2x128xf32, #tpu.memory_space<vmem>>, vector<1x2x128xf32>
    %272 = vector.shape_cast %271 : vector<1x2x128xf32> to vector<2x128xf32>
    %273 = arith.addf %269, %272 : vector<2x128xf32>
    %cst_111 = arith.constant dense<0xFF800000> : vector<2xf32>
    %274 = vector.multi_reduction <maximumf>, %273, %cst_111 [1] : vector<2x128xf32> to vector<2xf32>
    %275 = vector.shape_cast %274 : vector<2xf32> to vector<2x1xf32>
    %276 = vector.broadcast %275 : vector<2x1xf32> to vector<2x128xf32>
    %277 = arith.subf %273, %276 : vector<2x128xf32>
    %278 = math.exp %277 : vector<2x128xf32>
    %cst_112 = arith.constant dense<0.000000e+00> : vector<2xf32>
    %279 = vector.multi_reduction <add>, %278, %cst_112 [1] : vector<2x128xf32> to vector<2xf32>
    %280 = vector.shape_cast %279 : vector<2xf32> to vector<2x1xf32>
    %281 = tpu.reciprocal %280 {approx = true} : vector<2x1xf32> -> vector<2x1xf32>
    %282 = vector.broadcast %281 : vector<2x1xf32> to vector<2x128xf32>
    %283 = arith.mulf %278, %282 : vector<2x128xf32>
    %284 = arith.truncf %283 : vector<2x128xf32> to vector<2x128xbf16>
    %cst_113 = arith.constant dense<0.000000e+00> : vector<2x32xf32>
    %285 = tpu.matmul %284, %20, %cst_113 {dimension_numbers = #tpu.dot_dimension_numbers<[1], [0], [0], [1], [0, 0, 1, 1], [], []>} : vector<2x128xbf16>, vector<128x32xbf16>, vector<2x32xf32> -> vector<2x32xf32>
    %286 = arith.truncf %285 : vector<2x32xf32> to vector<2x32xbf16>
    %c4_i32 = arith.constant 4 : i32
    %287 = arith.truncf %255 : vector<2x32xf32> to vector<2x32xbf16>
    %cst_114 = arith.constant dense<0.000000e+00> : vector<2x32xf32>
    %288 = tpu.matmul %286, %1, %cst_114 {dimension_numbers = #tpu.dot_dimension_numbers<[1], [0], [0], [1], [0, 0, 1, 1], [], []>} : vector<2x32xbf16>, vector<32x32xbf16>, vector<2x32xf32> -> vector<2x32xf32>
    %cst_115 = arith.constant dense<0.000000e+00> : vector<2x32xf32>
    %289 = tpu.matmul %287, %7, %cst_115 {dimension_numbers = #tpu.dot_dimension_numbers<[1], [0], [0], [1], [0, 0, 1, 1], [], []>} : vector<2x32xbf16>, vector<32x32xbf16>, vector<2x32xf32> -> vector<2x32xf32>
    %290 = arith.addf %288, %289 : vector<2x32xf32>
    %291 = vector.broadcast %13 : vector<1x32xf32> to vector<2x32xf32>
    %292 = arith.addf %290, %291 : vector<2x32xf32>
    %293 = arith.negf %292 : vector<2x32xf32>
    %294 = math.exp %293 : vector<2x32xf32>
    %cst_116 = arith.constant 1.000000e+00 : f32
    %295 = vector.broadcast %cst_116 : f32 to vector<2x32xf32>
    %296 = arith.addf %295, %294 : vector<2x32xf32>
    %297 = arith.divf %295, %296 : vector<2x32xf32>
    %cst_117 = arith.constant dense<0.000000e+00> : vector<2x32xf32>
    %298 = tpu.matmul %286, %3, %cst_117 {dimension_numbers = #tpu.dot_dimension_numbers<[1], [0], [0], [1], [0, 0, 1, 1], [], []>} : vector<2x32xbf16>, vector<32x32xbf16>, vector<2x32xf32> -> vector<2x32xf32>
    %cst_118 = arith.constant dense<0.000000e+00> : vector<2x32xf32>
    %299 = tpu.matmul %287, %9, %cst_118 {dimension_numbers = #tpu.dot_dimension_numbers<[1], [0], [0], [1], [0, 0, 1, 1], [], []>} : vector<2x32xbf16>, vector<32x32xbf16>, vector<2x32xf32> -> vector<2x32xf32>
    %300 = arith.addf %298, %299 : vector<2x32xf32>
    %301 = vector.broadcast %15 : vector<1x32xf32> to vector<2x32xf32>
    %302 = arith.addf %300, %301 : vector<2x32xf32>
    %303 = arith.negf %302 : vector<2x32xf32>
    %304 = math.exp %303 : vector<2x32xf32>
    %cst_119 = arith.constant 1.000000e+00 : f32
    %305 = vector.broadcast %cst_119 : f32 to vector<2x32xf32>
    %306 = arith.addf %305, %304 : vector<2x32xf32>
    %307 = arith.divf %305, %306 : vector<2x32xf32>
    %cst_120 = arith.constant dense<0.000000e+00> : vector<2x32xf32>
    %308 = tpu.matmul %286, %5, %cst_120 {dimension_numbers = #tpu.dot_dimension_numbers<[1], [0], [0], [1], [0, 0, 1, 1], [], []>} : vector<2x32xbf16>, vector<32x32xbf16>, vector<2x32xf32> -> vector<2x32xf32>
    %309 = vector.broadcast %16 : vector<1x32xf32> to vector<2x32xf32>
    %310 = arith.addf %308, %309 : vector<2x32xf32>
    %cst_121 = arith.constant dense<0.000000e+00> : vector<2x32xf32>
    %311 = tpu.matmul %287, %11, %cst_121 {dimension_numbers = #tpu.dot_dimension_numbers<[1], [0], [0], [1], [0, 0, 1, 1], [], []>} : vector<2x32xbf16>, vector<32x32xbf16>, vector<2x32xf32> -> vector<2x32xf32>
    %312 = vector.broadcast %17 : vector<1x32xf32> to vector<2x32xf32>
    %313 = arith.addf %311, %312 : vector<2x32xf32>
    %314 = arith.mulf %297, %313 : vector<2x32xf32>
    %315 = arith.addf %310, %314 : vector<2x32xf32>
    %316 = math.tanh %315 : vector<2x32xf32>
    %cst_122 = arith.constant 1.000000e+00 : f32
    %317 = vector.broadcast %cst_122 : f32 to vector<2x32xf32>
    %318 = arith.subf %317, %307 : vector<2x32xf32>
    %319 = arith.mulf %318, %316 : vector<2x32xf32>
    %320 = arith.mulf %307, %255 : vector<2x32xf32>
    %321 = arith.addf %319, %320 : vector<2x32xf32>
    %322 = arith.truncf %321 : vector<2x32xf32> to vector<2x32xbf16>
    %cst_123 = arith.constant dense<0.000000e+00> : vector<2x128xf32>
    %323 = tpu.matmul %322, %18, %cst_123 {dimension_numbers = #tpu.dot_dimension_numbers<[1], [0], [0], [1], [0, 0, 1, 1], [], []>} : vector<2x32xbf16>, vector<32x128xbf16>, vector<2x128xf32> -> vector<2x128xf32>
    %324 = vector.broadcast %19 : vector<1x128xf32> to vector<2x128xf32>
    %325 = arith.addf %323, %324 : vector<2x128xf32>
    %326 = arith.index_cast %c4_i32 : i32 to index
    %c0_124 = arith.constant 0 : index
    %c0_125 = arith.constant 0 : index
    %327 = vector.load %arg11[%326, %c0_124, %c0_125] : memref<7x2x32xf32, #tpu.memory_space<vmem>>, vector<1x2x32xf32>
    %328 = vector.shape_cast %327 : vector<1x2x32xf32> to vector<2x32xf32>
    %329 = vector.shape_cast %321 : vector<2x32xf32> to vector<1x2x32xf32>
    tpu.vector_store %arg11[%326, %c0_124, %c0_125], %329 {strides = array<i32>} : memref<7x2x32xf32, #tpu.memory_space<vmem>>, vector<1x2x32xf32>,
    %330 = arith.index_cast %c4_i32 : i32 to index
    %c0_126 = arith.constant 0 : index
    %c0_127 = arith.constant 0 : index
    %331 = vector.load %arg12[%330, %c0_126, %c0_127] : memref<7x2x128xf32, #tpu.memory_space<vmem>>, vector<1x2x128xf32>
    %332 = vector.shape_cast %331 : vector<1x2x128xf32> to vector<2x128xf32>
    %333 = vector.shape_cast %325 : vector<2x128xf32> to vector<1x2x128xf32>
    tpu.vector_store %arg12[%330, %c0_126, %c0_127], %333 {strides = array<i32>} : memref<7x2x128xf32, #tpu.memory_space<vmem>>, vector<1x2x128xf32>,
    %cst_128 = arith.constant 2.000000e+00 : f32
    %334 = vector.broadcast %cst_128 : f32 to vector<2x128xf32>
    %335 = arith.mulf %325, %334 : vector<2x128xf32>
    %336 = arith.index_cast %c4_i32 : i32 to index
    %c0_129 = arith.constant 0 : index
    %c0_130 = arith.constant 0 : index
    %337 = vector.load %arg10[%336, %c0_129, %c0_130] : memref<7x2x128xf32, #tpu.memory_space<vmem>>, vector<1x2x128xf32>
    %338 = vector.shape_cast %337 : vector<1x2x128xf32> to vector<2x128xf32>
    %339 = arith.addf %335, %338 : vector<2x128xf32>
    %cst_131 = arith.constant dense<0xFF800000> : vector<2xf32>
    %340 = vector.multi_reduction <maximumf>, %339, %cst_131 [1] : vector<2x128xf32> to vector<2xf32>
    %341 = vector.shape_cast %340 : vector<2xf32> to vector<2x1xf32>
    %342 = vector.broadcast %341 : vector<2x1xf32> to vector<2x128xf32>
    %343 = arith.subf %339, %342 : vector<2x128xf32>
    %344 = math.exp %343 : vector<2x128xf32>
    %cst_132 = arith.constant dense<0.000000e+00> : vector<2xf32>
    %345 = vector.multi_reduction <add>, %344, %cst_132 [1] : vector<2x128xf32> to vector<2xf32>
    %346 = vector.shape_cast %345 : vector<2xf32> to vector<2x1xf32>
    %347 = tpu.reciprocal %346 {approx = true} : vector<2x1xf32> -> vector<2x1xf32>
    %348 = vector.broadcast %347 : vector<2x1xf32> to vector<2x128xf32>
    %349 = arith.mulf %344, %348 : vector<2x128xf32>
    %350 = arith.truncf %349 : vector<2x128xf32> to vector<2x128xbf16>
    %cst_133 = arith.constant dense<0.000000e+00> : vector<2x32xf32>
    %351 = tpu.matmul %350, %20, %cst_133 {dimension_numbers = #tpu.dot_dimension_numbers<[1], [0], [0], [1], [0, 0, 1, 1], [], []>} : vector<2x128xbf16>, vector<128x32xbf16>, vector<2x32xf32> -> vector<2x32xf32>
    %352 = arith.truncf %351 : vector<2x32xf32> to vector<2x32xbf16>
    %c5_i32 = arith.constant 5 : i32
    %353 = arith.truncf %321 : vector<2x32xf32> to vector<2x32xbf16>
    %cst_134 = arith.constant dense<0.000000e+00> : vector<2x32xf32>
    %354 = tpu.matmul %352, %1, %cst_134 {dimension_numbers = #tpu.dot_dimension_numbers<[1], [0], [0], [1], [0, 0, 1, 1], [], []>} : vector<2x32xbf16>, vector<32x32xbf16>, vector<2x32xf32> -> vector<2x32xf32>
    %cst_135 = arith.constant dense<0.000000e+00> : vector<2x32xf32>
    %355 = tpu.matmul %353, %7, %cst_135 {dimension_numbers = #tpu.dot_dimension_numbers<[1], [0], [0], [1], [0, 0, 1, 1], [], []>} : vector<2x32xbf16>, vector<32x32xbf16>, vector<2x32xf32> -> vector<2x32xf32>
    %356 = arith.addf %354, %355 : vector<2x32xf32>
    %357 = vector.broadcast %13 : vector<1x32xf32> to vector<2x32xf32>
    %358 = arith.addf %356, %357 : vector<2x32xf32>
    %359 = arith.negf %358 : vector<2x32xf32>
    %360 = math.exp %359 : vector<2x32xf32>
    %cst_136 = arith.constant 1.000000e+00 : f32
    %361 = vector.broadcast %cst_136 : f32 to vector<2x32xf32>
    %362 = arith.addf %361, %360 : vector<2x32xf32>
    %363 = arith.divf %361, %362 : vector<2x32xf32>
    %cst_137 = arith.constant dense<0.000000e+00> : vector<2x32xf32>
    %364 = tpu.matmul %352, %3, %cst_137 {dimension_numbers = #tpu.dot_dimension_numbers<[1], [0], [0], [1], [0, 0, 1, 1], [], []>} : vector<2x32xbf16>, vector<32x32xbf16>, vector<2x32xf32> -> vector<2x32xf32>
    %cst_138 = arith.constant dense<0.000000e+00> : vector<2x32xf32>
    %365 = tpu.matmul %353, %9, %cst_138 {dimension_numbers = #tpu.dot_dimension_numbers<[1], [0], [0], [1], [0, 0, 1, 1], [], []>} : vector<2x32xbf16>, vector<32x32xbf16>, vector<2x32xf32> -> vector<2x32xf32>
    %366 = arith.addf %364, %365 : vector<2x32xf32>
    %367 = vector.broadcast %15 : vector<1x32xf32> to vector<2x32xf32>
    %368 = arith.addf %366, %367 : vector<2x32xf32>
    %369 = arith.negf %368 : vector<2x32xf32>
    %370 = math.exp %369 : vector<2x32xf32>
    %cst_139 = arith.constant 1.000000e+00 : f32
    %371 = vector.broadcast %cst_139 : f32 to vector<2x32xf32>
    %372 = arith.addf %371, %370 : vector<2x32xf32>
    %373 = arith.divf %371, %372 : vector<2x32xf32>
    %cst_140 = arith.constant dense<0.000000e+00> : vector<2x32xf32>
    %374 = tpu.matmul %352, %5, %cst_140 {dimension_numbers = #tpu.dot_dimension_numbers<[1], [0], [0], [1], [0, 0, 1, 1], [], []>} : vector<2x32xbf16>, vector<32x32xbf16>, vector<2x32xf32> -> vector<2x32xf32>
    %375 = vector.broadcast %16 : vector<1x32xf32> to vector<2x32xf32>
    %376 = arith.addf %374, %375 : vector<2x32xf32>
    %cst_141 = arith.constant dense<0.000000e+00> : vector<2x32xf32>
    %377 = tpu.matmul %353, %11, %cst_141 {dimension_numbers = #tpu.dot_dimension_numbers<[1], [0], [0], [1], [0, 0, 1, 1], [], []>} : vector<2x32xbf16>, vector<32x32xbf16>, vector<2x32xf32> -> vector<2x32xf32>
    %378 = vector.broadcast %17 : vector<1x32xf32> to vector<2x32xf32>
    %379 = arith.addf %377, %378 : vector<2x32xf32>
    %380 = arith.mulf %363, %379 : vector<2x32xf32>
    %381 = arith.addf %376, %380 : vector<2x32xf32>
    %382 = math.tanh %381 : vector<2x32xf32>
    %cst_142 = arith.constant 1.000000e+00 : f32
    %383 = vector.broadcast %cst_142 : f32 to vector<2x32xf32>
    %384 = arith.subf %383, %373 : vector<2x32xf32>
    %385 = arith.mulf %384, %382 : vector<2x32xf32>
    %386 = arith.mulf %373, %321 : vector<2x32xf32>
    %387 = arith.addf %385, %386 : vector<2x32xf32>
    %388 = arith.truncf %387 : vector<2x32xf32> to vector<2x32xbf16>
    %cst_143 = arith.constant dense<0.000000e+00> : vector<2x128xf32>
    %389 = tpu.matmul %388, %18, %cst_143 {dimension_numbers = #tpu.dot_dimension_numbers<[1], [0], [0], [1], [0, 0, 1, 1], [], []>} : vector<2x32xbf16>, vector<32x128xbf16>, vector<2x128xf32> -> vector<2x128xf32>
    %390 = vector.broadcast %19 : vector<1x128xf32> to vector<2x128xf32>
    %391 = arith.addf %389, %390 : vector<2x128xf32>
    %392 = arith.index_cast %c5_i32 : i32 to index
    %c0_144 = arith.constant 0 : index
    %c0_145 = arith.constant 0 : index
    %393 = vector.load %arg11[%392, %c0_144, %c0_145] : memref<7x2x32xf32, #tpu.memory_space<vmem>>, vector<1x2x32xf32>
    %394 = vector.shape_cast %393 : vector<1x2x32xf32> to vector<2x32xf32>
    %395 = vector.shape_cast %387 : vector<2x32xf32> to vector<1x2x32xf32>
    tpu.vector_store %arg11[%392, %c0_144, %c0_145], %395 {strides = array<i32>} : memref<7x2x32xf32, #tpu.memory_space<vmem>>, vector<1x2x32xf32>,
    %396 = arith.index_cast %c5_i32 : i32 to index
    %c0_146 = arith.constant 0 : index
    %c0_147 = arith.constant 0 : index
    %397 = vector.load %arg12[%396, %c0_146, %c0_147] : memref<7x2x128xf32, #tpu.memory_space<vmem>>, vector<1x2x128xf32>
    %398 = vector.shape_cast %397 : vector<1x2x128xf32> to vector<2x128xf32>
    %399 = vector.shape_cast %391 : vector<2x128xf32> to vector<1x2x128xf32>
    tpu.vector_store %arg12[%396, %c0_146, %c0_147], %399 {strides = array<i32>} : memref<7x2x128xf32, #tpu.memory_space<vmem>>, vector<1x2x128xf32>,
    %cst_148 = arith.constant 2.000000e+00 : f32
    %400 = vector.broadcast %cst_148 : f32 to vector<2x128xf32>
    %401 = arith.mulf %391, %400 : vector<2x128xf32>
    %402 = arith.index_cast %c5_i32 : i32 to index
    %c0_149 = arith.constant 0 : index
    %c0_150 = arith.constant 0 : index
    %403 = vector.load %arg10[%402, %c0_149, %c0_150] : memref<7x2x128xf32, #tpu.memory_space<vmem>>, vector<1x2x128xf32>
    %404 = vector.shape_cast %403 : vector<1x2x128xf32> to vector<2x128xf32>
    %405 = arith.addf %401, %404 : vector<2x128xf32>
    %cst_151 = arith.constant dense<0xFF800000> : vector<2xf32>
    %406 = vector.multi_reduction <maximumf>, %405, %cst_151 [1] : vector<2x128xf32> to vector<2xf32>
    %407 = vector.shape_cast %406 : vector<2xf32> to vector<2x1xf32>
    %408 = vector.broadcast %407 : vector<2x1xf32> to vector<2x128xf32>
    %409 = arith.subf %405, %408 : vector<2x128xf32>
    %410 = math.exp %409 : vector<2x128xf32>
    %cst_152 = arith.constant dense<0.000000e+00> : vector<2xf32>
    %411 = vector.multi_reduction <add>, %410, %cst_152 [1] : vector<2x128xf32> to vector<2xf32>
    %412 = vector.shape_cast %411 : vector<2xf32> to vector<2x1xf32>
    %413 = tpu.reciprocal %412 {approx = true} : vector<2x1xf32> -> vector<2x1xf32>
    %414 = vector.broadcast %413 : vector<2x1xf32> to vector<2x128xf32>
    %415 = arith.mulf %410, %414 : vector<2x128xf32>
    %416 = arith.truncf %415 : vector<2x128xf32> to vector<2x128xbf16>
    %cst_153 = arith.constant dense<0.000000e+00> : vector<2x32xf32>
    %417 = tpu.matmul %416, %20, %cst_153 {dimension_numbers = #tpu.dot_dimension_numbers<[1], [0], [0], [1], [0, 0, 1, 1], [], []>} : vector<2x128xbf16>, vector<128x32xbf16>, vector<2x32xf32> -> vector<2x32xf32>
    %418 = arith.truncf %417 : vector<2x32xf32> to vector<2x32xbf16>
    %c6_i32 = arith.constant 6 : i32
    %419 = arith.truncf %387 : vector<2x32xf32> to vector<2x32xbf16>
    %cst_154 = arith.constant dense<0.000000e+00> : vector<2x32xf32>
    %420 = tpu.matmul %418, %1, %cst_154 {dimension_numbers = #tpu.dot_dimension_numbers<[1], [0], [0], [1], [0, 0, 1, 1], [], []>} : vector<2x32xbf16>, vector<32x32xbf16>, vector<2x32xf32> -> vector<2x32xf32>
    %cst_155 = arith.constant dense<0.000000e+00> : vector<2x32xf32>
    %421 = tpu.matmul %419, %7, %cst_155 {dimension_numbers = #tpu.dot_dimension_numbers<[1], [0], [0], [1], [0, 0, 1, 1], [], []>} : vector<2x32xbf16>, vector<32x32xbf16>, vector<2x32xf32> -> vector<2x32xf32>
    %422 = arith.addf %420, %421 : vector<2x32xf32>
    %423 = vector.broadcast %13 : vector<1x32xf32> to vector<2x32xf32>
    %424 = arith.addf %422, %423 : vector<2x32xf32>
    %425 = arith.negf %424 : vector<2x32xf32>
    %426 = math.exp %425 : vector<2x32xf32>
    %cst_156 = arith.constant 1.000000e+00 : f32
    %427 = vector.broadcast %cst_156 : f32 to vector<2x32xf32>
    %428 = arith.addf %427, %426 : vector<2x32xf32>
    %429 = arith.divf %427, %428 : vector<2x32xf32>
    %cst_157 = arith.constant dense<0.000000e+00> : vector<2x32xf32>
    %430 = tpu.matmul %418, %3, %cst_157 {dimension_numbers = #tpu.dot_dimension_numbers<[1], [0], [0], [1], [0, 0, 1, 1], [], []>} : vector<2x32xbf16>, vector<32x32xbf16>, vector<2x32xf32> -> vector<2x32xf32>
    %cst_158 = arith.constant dense<0.000000e+00> : vector<2x32xf32>
    %431 = tpu.matmul %419, %9, %cst_158 {dimension_numbers = #tpu.dot_dimension_numbers<[1], [0], [0], [1], [0, 0, 1, 1], [], []>} : vector<2x32xbf16>, vector<32x32xbf16>, vector<2x32xf32> -> vector<2x32xf32>
    %432 = arith.addf %430, %431 : vector<2x32xf32>
    %433 = vector.broadcast %15 : vector<1x32xf32> to vector<2x32xf32>
    %434 = arith.addf %432, %433 : vector<2x32xf32>
    %435 = arith.negf %434 : vector<2x32xf32>
    %436 = math.exp %435 : vector<2x32xf32>
    %cst_159 = arith.constant 1.000000e+00 : f32
    %437 = vector.broadcast %cst_159 : f32 to vector<2x32xf32>
    %438 = arith.addf %437, %436 : vector<2x32xf32>
    %439 = arith.divf %437, %438 : vector<2x32xf32>
    %cst_160 = arith.constant dense<0.000000e+00> : vector<2x32xf32>
    %440 = tpu.matmul %418, %5, %cst_160 {dimension_numbers = #tpu.dot_dimension_numbers<[1], [0], [0], [1], [0, 0, 1, 1], [], []>} : vector<2x32xbf16>, vector<32x32xbf16>, vector<2x32xf32> -> vector<2x32xf32>
    %441 = vector.broadcast %16 : vector<1x32xf32> to vector<2x32xf32>
    %442 = arith.addf %440, %441 : vector<2x32xf32>
    %cst_161 = arith.constant dense<0.000000e+00> : vector<2x32xf32>
    %443 = tpu.matmul %419, %11, %cst_161 {dimension_numbers = #tpu.dot_dimension_numbers<[1], [0], [0], [1], [0, 0, 1, 1], [], []>} : vector<2x32xbf16>, vector<32x32xbf16>, vector<2x32xf32> -> vector<2x32xf32>
    %444 = vector.broadcast %17 : vector<1x32xf32> to vector<2x32xf32>
    %445 = arith.addf %443, %444 : vector<2x32xf32>
    %446 = arith.mulf %429, %445 : vector<2x32xf32>
    %447 = arith.addf %442, %446 : vector<2x32xf32>
    %448 = math.tanh %447 : vector<2x32xf32>
    %cst_162 = arith.constant 1.000000e+00 : f32
    %449 = vector.broadcast %cst_162 : f32 to vector<2x32xf32>
    %450 = arith.subf %449, %439 : vector<2x32xf32>
    %451 = arith.mulf %450, %448 : vector<2x32xf32>
    %452 = arith.mulf %439, %387 : vector<2x32xf32>
    %453 = arith.addf %451, %452 : vector<2x32xf32>
    %454 = arith.truncf %453 : vector<2x32xf32> to vector<2x32xbf16>
    %cst_163 = arith.constant dense<0.000000e+00> : vector<2x128xf32>
    %455 = tpu.matmul %454, %18, %cst_163 {dimension_numbers = #tpu.dot_dimension_numbers<[1], [0], [0], [1], [0, 0, 1, 1], [], []>} : vector<2x32xbf16>, vector<32x128xbf16>, vector<2x128xf32> -> vector<2x128xf32>
    %456 = vector.broadcast %19 : vector<1x128xf32> to vector<2x128xf32>
    %457 = arith.addf %455, %456 : vector<2x128xf32>
    %458 = arith.index_cast %c6_i32 : i32 to index
    %c0_164 = arith.constant 0 : index
    %c0_165 = arith.constant 0 : index
    %459 = vector.load %arg11[%458, %c0_164, %c0_165] : memref<7x2x32xf32, #tpu.memory_space<vmem>>, vector<1x2x32xf32>
    %460 = vector.shape_cast %459 : vector<1x2x32xf32> to vector<2x32xf32>
    %461 = vector.shape_cast %453 : vector<2x32xf32> to vector<1x2x32xf32>
    tpu.vector_store %arg11[%458, %c0_164, %c0_165], %461 {strides = array<i32>} : memref<7x2x32xf32, #tpu.memory_space<vmem>>, vector<1x2x32xf32>,
    %462 = arith.index_cast %c6_i32 : i32 to index
    %c0_166 = arith.constant 0 : index
    %c0_167 = arith.constant 0 : index
    %463 = vector.load %arg12[%462, %c0_166, %c0_167] : memref<7x2x128xf32, #tpu.memory_space<vmem>>, vector<1x2x128xf32>
    %464 = vector.shape_cast %463 : vector<1x2x128xf32> to vector<2x128xf32>
    %465 = vector.shape_cast %457 : vector<2x128xf32> to vector<1x2x128xf32>
    tpu.vector_store %arg12[%462, %c0_166, %c0_167], %465 {strides = array<i32>} : memref<7x2x128xf32, #tpu.memory_space<vmem>>, vector<1x2x128xf32>,
    %cst_168 = arith.constant 2.000000e+00 : f32
    %466 = vector.broadcast %cst_168 : f32 to vector<2x128xf32>
    %467 = arith.mulf %457, %466 : vector<2x128xf32>
    %468 = arith.index_cast %c6_i32 : i32 to index
    %c0_169 = arith.constant 0 : index
    %c0_170 = arith.constant 0 : index
    %469 = vector.load %arg10[%468, %c0_169, %c0_170] : memref<7x2x128xf32, #tpu.memory_space<vmem>>, vector<1x2x128xf32>
    %470 = vector.shape_cast %469 : vector<1x2x128xf32> to vector<2x128xf32>
    %471 = arith.addf %467, %470 : vector<2x128xf32>
    %cst_171 = arith.constant dense<0xFF800000> : vector<2xf32>
    %472 = vector.multi_reduction <maximumf>, %471, %cst_171 [1] : vector<2x128xf32> to vector<2xf32>
    %473 = vector.shape_cast %472 : vector<2xf32> to vector<2x1xf32>
    %474 = vector.broadcast %473 : vector<2x1xf32> to vector<2x128xf32>
    %475 = arith.subf %471, %474 : vector<2x128xf32>
    %476 = math.exp %475 : vector<2x128xf32>
    %cst_172 = arith.constant dense<0.000000e+00> : vector<2xf32>
    %477 = vector.multi_reduction <add>, %476, %cst_172 [1] : vector<2x128xf32> to vector<2xf32>
    %478 = vector.shape_cast %477 : vector<2xf32> to vector<2x1xf32>
    %479 = tpu.reciprocal %478 {approx = true} : vector<2x1xf32> -> vector<2x1xf32>
    %480 = vector.broadcast %479 : vector<2x1xf32> to vector<2x128xf32>
    %481 = arith.mulf %476, %480 : vector<2x128xf32>
    %482 = arith.truncf %481 : vector<2x128xf32> to vector<2x128xbf16>
    %cst_173 = arith.constant dense<0.000000e+00> : vector<2x32xf32>
    %483 = tpu.matmul %482, %20, %cst_173 {dimension_numbers = #tpu.dot_dimension_numbers<[1], [0], [0], [1], [0, 0, 1, 1], [], []>} : vector<2x128xbf16>, vector<128x32xbf16>, vector<2x32xf32> -> vector<2x32xf32>
    %484 = arith.truncf %483 : vector<2x32xf32> to vector<2x32xbf16>
    %c7_i32 = arith.constant 7 : i32
    return
  }
}

</mosaic_0001>

<bundles_post_ra>
// kernel: tpu_custom_call.1
= control target key start
LH: loop header
LB: loop body
LE: loop exit
PB: predicated region body
PF: predicated region fallthrough
CT: control target
= control target key end

     0   :  { %18 = vsyncpa [#allocation3], 0  ;;  %s2551_s0 = inlined_call_operand.vmem [shape: f32[2,32], index: 0, kind: input, shape index: {}]   ;;  %s2552_s1 = inlined_call_operand.hbm [shape: bf16[2,32], index: 1, kind: input, shape index: {}]   ;;  %s2553_s2 = inlined_call_operand.vmem [shape: bf16[3,32,32], index: 2, kind: input, shape index: {}]   ;;  %s2554_s3 = inlined_call_operand.hbm [shape: bf16[3,32,32], index: 3, kind: input, shape index: {}]   ;;  %s2555_s4 = inlined_call_operand.vmem [shape: f32[2,1,32], index: 4, kind: input, shape index: {}]   ;;  %s2556_s5 = inlined_call_operand.vmem [shape: f32[1,32], index: 5, kind: input, shape index: {}]   ;;  %s2557_s6 = inlined_call_operand.vmem [shape: f32[1,32], index: 6, kind: input, shape index: {}]   ;;  %s2558_s7 = inlined_call_operand.vmem [shape: bf16[32,128], index: 7, kind: input, shape index: {}]   ;;  %s2559_s8 = inlined_call_operand.vmem [shape: f32[1,128], index: 8, kind: input, shape index: {}]   ;;  %s2560_s9 = inlined_call_operand.vmem [shape: bf16[128,32], index: 9, kind: input, shape index: {}]   ;;  %s2561_s10 = inlined_call_operand.vmem [shape: f32[7,2,128], index: 10, kind: input, shape index: {}]   ;;  %s2562_s11 = inlined_call_operand.hbm [shape: f32[7,2,32], index: 11, kind: output, shape index: {0}]   ;;  %s2563_s12 = inlined_call_operand.hbm [shape: f32[7,2,128], index: 12, kind: output, shape index: {1}]  }
   0x1   :  { %19 = vsyncpa [#allocation6], 0 }
   0x2   :  { %20 = vsyncpa [#allocation4], 0 }
   0x3   :  { %21 = vsyncpa [#allocation9], 0  ;;  %s29_s23 = sshll.u32 %s2552_s1, 4  ;;  %s1958_s24 = smov [#allocation2]   ;;  %s30_s23 = int_to_ptr.hbm [resolvable:$true] %s29_s23 }
   0x4   :  { %s31_s25 = sshll.u32 %s1958_s24, 4  ;;  %s41_s28 = sshll.u32 %s2554_s3, 4  ;;  %s32_s25 = int_to_ptr.vmem [resolvable:$true] %s31_s25  ;;  %s42_s28 = int_to_ptr.hbm [resolvable:$true] %s41_s28 }
   0x5   :  { %34 = dma.hbm_to_vmem [thread:$0]  %s30_s23, 16, %s32_s25, [#allocation3]  }
   0x6   :  { %s1959_s29 = smov [#allocation5]   ;;  %s1960_s13 = smov 64  }
   0x7   :  { %s43_s30 = sshll.u32 %s1959_s29, 4  ;;  %s1961_s14 = smov 4   ;;  %s44_s30 = int_to_ptr.vmem [resolvable:$true] %s43_s30 }
   0x8   :  { %49 = dma.hbm_to_vmem [thread:$0]  %s42_s28, 768, %s44_s30, [#allocation6], %s1960_s13, %s1960_s13, %s1961_s14  }
   0x9   :  { %1950 = dma.done.wait [#allocation3], 16  }
   0xa   :  { %1951 = vsyncadd [#allocation3], 4294967280 }
   0xb   :  { %1952 = dma.done.wait [#allocation6], 768  }
   0xc   :  { %1953 = vsyncadd [#allocation6], 4294966528  ;;  %v2037_v0 = vld [vmem:[#allocation5 + $0x8] sm:$0xff]  ;;  %v2044_v2 = vld [vmem:[#allocation5 + $0x18] sm:$0xff]  ;;  %vm142_vm0 = vcmask 261120   ;;  %vm378_vm9 = vcmask 254976  }
   0xd   :  { %v2042_v1 = vld [vmem:[%s2553_s2 + $0x8] sm:$0xff]  ;;  %v2049_v3 = vld [vmem:[%s2553_s2 + $0x18] sm:$0xff]  ;;  %152 = vmatpush.bf16.msra.mxu0 %v2037_v0  ;;  %v2058_v5 = vld [vmem:[%s2553_s2] sm:$0xff]  ;;  %228 = vmatpush.bf16.msra.mxu2 %v2044_v2  ;;  %vm384_vm10 = vcmask 1041408   ;;  %s1509_s26 = sshll.u32 %s2562_s11, 4  ;;  %s1963_s27 = smov 32   ;;  %s1510_s26 = int_to_ptr.hbm [resolvable:$true] %s1509_s26 }
   0xe   :  { %180 = vmatpush.bf16.msra.mxu1 %v2042_v1  ;;  %v2053_v4 = vld [vmem:[#allocation5] sm:$0xff]  ;;  %v2063_v6 = vld [vmem:[%s2551_s0] sm:$0x3]  ;;  %253 = vmatpush.bf16.msra.mxu3 %v2049_v3  ;;  %v2067_v7 = vld [vmem:[#allocation5 + $0x10] sm:$0xff]  ;;  %s1964_s28 = smov 2   ;;  %s1965_s29 = smov [#allocation8]  }
   0xf   :  { %v2072_v8 = vld [vmem:[%s2553_s2 + $0x10] sm:$0xff]  ;;  %v2079_v10 = vld [vmem:[%s2553_s2 + $0x28] sm:$0xff]  ;;  %v129_v11 = vpack.c.bf16 %v2063_v6, %v2063_v6  ;;  %v128_v12 = vld [vmem:[#allocation2] sm:$0x1]  ;;  %s1520_s30 = sshll.u32 %s1965_s29, 4  ;;  %s1522_s14 = sshll.u32 %s2563_s12, 4  ;;  %s1521_s30 = int_to_ptr.vmem [resolvable:$true] %s1520_s30  ;;  %s1523_s14 = int_to_ptr.hbm [resolvable:$true] %s1522_s14 }
  0x10   :  { %v2074_v9 = vld [vmem:[#allocation5 + $0x28] sm:$0xff]  ;;  %v2089_v13 = vld [vmem:[#allocation5 + $0x20] sm:$0xff]  ;;  %v2115_v15 = vld [vmem:[%s2555_s4] ss:$0 sm:$0xff] }
  0x11   :  { %153 = vmatpush.bf16.msra.mxu0 %v2053_v4  ;;  %229 = vmatpush.bf16.msra.mxu2 %v2067_v7  ;;  %v2094_v14 = vld [vmem:[%s2553_s2 + $0x20] sm:$0xff]  ;;  %v2127_v28 = vld [vmem:[%s2558_s7 + $0x8] sm:$0xff] }
  0x12   :  { %181 = vmatpush.bf16.msra.mxu1 %v2058_v5  ;;  %254 = vmatpush.bf16.msra.mxu3 %v2072_v8  ;;  %v2121_v21 = vld [vmem:[%s2555_s4 + $0x1] ss:$0 sm:$0xff]  ;;  %v2141_v44 = vld [vmem:[%s2557_s6] ss:$0 sm:$0xff] }
  0x13   :  { %v2133_v30 = vld [vmem:[%s2558_s7] sm:$0xff] }
  0x14   :  { %1558 = vmatmul.msk.bf16.vlgmr.msra.gmra.mxu0 %vm142_vm0, %v129_v11  ;;  %1577 = vmatmul.msk.bf16.vlgmr.msra.gmra.mxu2 %vm142_vm0, %v129_v11  ;;  %v2146_v48 = vld [vmem:[%s2556_s5] ss:$0 sm:$0xff] }
  0x15   :  { %304 = vmatpush.bf16.msrb.mxu0 %v2079_v10  ;;  %1567 = vmatmul.msk.bf16.vlgmr.msra.gmra.mxu1 %vm142_vm0, %v128_v12 }
  0x16   :  { %332 = vmatpush.bf16.msrb.mxu1 %v2074_v9  ;;  %1586 = vmatmul.msk.bf16.vlgmr.msra.gmra.mxu3 %vm142_vm0, %v128_v12 }
  0x17   :  { %371 = vmatpush.bf16.msrb.mxu2 %v2127_v28 }
  0x19   :  { %305 = vmatpush.bf16.msrb.mxu0 %v2094_v14 }
  0x1a   :  { %333 = vmatpush.bf16.msrb.mxu1 %v2089_v13 }
  0x1b   :  { %372 = vmatpush.bf16.msrb.mxu2 %v2133_v30 }
  0x1d   :  { %465 = vmatpush.bf16.msra.mxu0 %v2037_v0 }
  0x1e   :  { %481 = vmatpush.bf16.msra.mxu1 %v2042_v1 }
  0x1f   :  { %514 = vmatpush.bf16.msra.mxu2 %v2044_v2 }
  0x21   :  { %466 = vmatpush.bf16.msra.mxu0 %v2053_v4 }
  0x22   :  { %482 = vmatpush.bf16.msra.mxu1 %v2058_v5 }
  0x23   :  { %515 = vmatpush.bf16.msra.mxu2 %v2067_v7 }
  0x24   :  { %1596 = vmatmul.msk.bf16.vlgmr.msrb.gmra.mxu0 %vm142_vm0, %v128_v12 }
  0x25   :  { %1605 = vmatmul.msk.bf16.vlgmr.msrb.gmra.mxu1 %vm142_vm0, %v129_v11  ;;  %527 = vmatpush.bf16.msrb.mxu0 %v2049_v3 }
  0x26   :  { %560 = vmatpush.bf16.msrb.mxu1 %v2079_v10 }
  0x29   :  { %528 = vmatpush.bf16.msrb.mxu0 %v2072_v8 }
  0x2a   :  { %561 = vmatpush.bf16.msrb.mxu1 %v2094_v14 }
  0x91   :  { %v155_v16 = vpop.f32.mrf.mxu0 }
  0x92   :  { %v183_v17 = vpop.f32.mrf.mxu1 }
  0x93   :  { %v184_v18 = vadd.f32 %v183_v17, %v155_v16 }
  0x95   :  { %v190_v19 = vadd.f32 %v2115_v15, %v184_v18 }
  0x97   :  { %v1568_v20 = vmul.f32 -1.442695, %v190_v19  ;;  %v231_v22 = vpop.f32.mrf.mxu2 }
  0x99   :  { %1741 = vpow2.f32 %v1568_v20  ;;  %v256_v23 = vpop.f32.mrf.mxu3  ;;  %v157_v25 = vpop.f32.mrf.mxu0 }
  0x9a   :  { %v257_v24 = vadd.f32 %v256_v23, %v231_v22  ;;  %v185_v26 = vpop.f32.mrf.mxu1 }
  0x9c   :  { %v263_v27 = vadd.f32 %v2121_v21, %v257_v24  ;;  %v2172_v24 = vld [vmem:[%s2559_s8] ss:$0 sm:$0xff] }
  0x9e   :  { %v1587_v29 = vmul.f32 -1.442695, %v263_v27 }
  0x9f   :  { %v1742_v31 = vpop.eup %1741  ;;  %v233_v33 = vpop.f32.mrf.mxu2 }
  0xa0   :  { %v194_v32 = vadd.f32 1.0, %v1742_v31  ;;  %1743 = vpow2.f32 %v1587_v29  ;;  %v382_v29 = vld [vmem:[%s2561_s10] sm:$0x3] }
  0xa1   :  { %v258_v34 = vpop.f32.mrf.mxu3  ;;  %v307_v36 = vpop.f32.mrf.mxu0 }
  0xa2   :  { %1745 = vrcp.f32 %v194_v32  ;;  %v335_v35 = vpop.f32.mrf.mxu1  ;;  %v206_v45 = vand.u32 2147483648, %v194_v32  ;;  %v204_v47 = vand.u32 2147483647, %v194_v32  ;;  %vm200_vm2 = vweird.f32 %v194_v32 }
  0xa3   :  { %v336_v51 = vadd.f32 %v2141_v44, %v335_v35  ;;  %v308_v55 = vadd.f32 %v2146_v48, %v307_v36 }
  0xa4   :  { %v207_v53 = vor.u32 1.1754944e-38, %v206_v45  ;;  %vm205_vm4 = vcmp.eq.f32.partialorder %v204_v47, 8.507059e+37 }
  0xa6   :  { %v1744_v37 = vpop.eup %1743 }
  0xa7   :  { %v267_v38 = vadd.f32 1.0, %v1744_v37 }
  0xa8   :  { %v1746_v39 = vpop.eup %1745 }
  0xa9   :  { %1747 = vrcp.f32 %v267_v38  ;;  %v196_v40 = vmul.f32 %v1746_v39, %v194_v32  ;;  %v309_v42 = vpop.f32.mrf.mxu0  ;;  %vm201_vm1 = vweird.f32 %v1746_v39  ;;  %v279_v58 = vand.u32 2147483648, %v267_v38 }
  0xaa   :  { %v337_v41 = vpop.f32.mrf.mxu1  ;;  %vm202_vm3 = vmor %vm200_vm2, %vm201_vm1  ;;  %v277_v61 = vand.u32 2147483647, %v267_v38  ;;  %vm273_vm6 = vweird.f32 %v267_v38  ;;  %v2204_v42 = vld [vmem:[%s2560_s9 + $0x20] sm:$0xff] }
  0xab   :  { %v197_v43 = vsub.f32 1.0, %v196_v40  ;;  %v280_v11 = vor.u32 1.1754944e-38, %v279_v58  ;;  %v2190_v40 = vld [vmem:[%s2560_s9 + $0x30] sm:$0xff]  ;;  %v2197_v41 = vld [vmem:[%s2560_s9 + $0x28] sm:$0xff] }
  0xac   :  { %vm278_vm8 = vcmp.eq.f32.partialorder %v277_v61, 8.507059e+37 }
  0xad   :  { %v198_v46 = vmul.f32 %v1746_v39, %v197_v43  ;;  %v2211_v43 = vld [vmem:[%s2560_s9 + $0x18] sm:$0xff] }
  0xaf   :  { %v1748_v49 = vpop.eup %1747  ;;  %v199_v50 = vadd.f32 %v1746_v39, %v198_v46 }
  0xb0   :  { %v269_v52 = vmul.f32 %v1748_v49, %v267_v38  ;;  %vm274_vm5 = vweird.f32 %v1748_v49 }
  0xb1   :  { %v203_v54 = vsel %vm202_vm3, %v1746_v39, %v199_v50  ;;  %vm275_vm7 = vmor %vm273_vm6, %vm274_vm5  ;;  %v2184_v39 = vld [vmem:[%s2560_s9 + $0x38] sm:$0xff] }
  0xb2   :  { %v270_v56 = vsub.f32 1.0, %v269_v52  ;;  %v208_v57 = vsel %vm205_vm4, %v207_v53, %v203_v54  ;;  %445 = vmatpush.bf16.msrb.mxu3 %v2184_v39  ;;  %v2226_v52 = vld [vmem:[%s2560_s9 + $0x8] sm:$0xff]  ;;  %v2233_v53 = vld [vmem:[%s2560_s9] sm:$0xff] }
  0xb3   :  { %v339_v59 = vmul.f32 %v336_v51, %v208_v57  ;;  %v2220_v51 = vld [vmem:[%s2560_s9 + $0x10] sm:$0xff] }
  0xb4   :  { %v271_v60 = vmul.f32 %v1748_v49, %v270_v56 }
  0xb5   :  { %v340_v62 = vadd.f32 %v339_v59, %v308_v55 }
  0xb6   :  { %v272_v63 = vadd.f32 %v1748_v49, %v271_v60  ;;  %446 = vmatpush.bf16.msrb.mxu3 %v2190_v40 }
  0xb7   :  { %1749 = vtanh.f32 %v340_v62 }
  0xb8   :  { %v276_v12 = vsel %vm275_vm7, %v1748_v49, %v272_v63 }
  0xb9   :  { %v281_v16 = vsel %vm278_vm8, %v280_v11, %v276_v12 }
  0xba   :  { %v342_v17 = vsub.f32 1.0, %v281_v16  ;;  %v344_v20 = vmul.f32 %v281_v16, %v2063_v6  ;;  %447 = vmatpush.bf16.msrb.mxu3 %v2197_v41 }
  0xbd   :  { %v1750_v18 = vpop.eup %1749 }
  0xbe   :  { %v343_v19 = vmul.f32 %v1750_v18, %v342_v17  ;;  %448 = vmatpush.bf16.msrb.mxu3 %v2204_v42 }
  0xc0   :  { %v2151_v22 = vadd.f32 %v344_v20, %v343_v19 }
  0xc2   :  { %v346_v23 = vpack.c.bf16 %v2151_v22, %v2151_v22  ;;  %379 = vst.msk [vmem:[#allocation7] sm:$0x3] %vm378_vm9, %v2151_v22  ;;  %449 = vmatpush.bf16.msrb.mxu3 %v2211_v43 }
  0xc4   :  { %1614 = vmatmul.msk.bf16.vlgmr.msrb.gmra.mxu2 %vm142_vm0, %v346_v23  ;;  %1647 = vmatmul.msk.bf16.vlgmr.msra.gmra.mxu0 %vm142_vm0, %v346_v23 }
  0xc5   :  { %573 = vmatpush.bf16.msrb.mxu2 %v2074_v9  ;;  %624 = vmatpush.bf16.msra.mxu0 %v2184_v39 }
  0xc6   :  { %450 = vmatpush.bf16.msrb.mxu3 %v2220_v51 }
  0xc9   :  { %574 = vmatpush.bf16.msrb.mxu2 %v2089_v13  ;;  %625 = vmatpush.bf16.msra.mxu0 %v2190_v40 }
  0xca   :  { %451 = vmatpush.bf16.msrb.mxu3 %v2226_v52 }
  0xcd   :  { %626 = vmatpush.bf16.msra.mxu0 %v2197_v41 }
  0xce   :  { %452 = vmatpush.bf16.msrb.mxu3 %v2233_v53 }
  0xd1   :  { %627 = vmatpush.bf16.msra.mxu0 %v2204_v42 }
  0xd2   :  { %597 = vmatpush.bf16.msra.mxu3 %v2127_v28 }
  0xd4   :  { %1650 = vmatmul.msk.bf16.vlgmr.msra.gmra.mxu2 %vm142_vm0, %v346_v23 }
  0xd5   :  { %660 = vmatpush.bf16.msra.mxu2 %v2042_v1  ;;  %628 = vmatpush.bf16.msra.mxu0 %v2211_v43 }
  0xd6   :  { %598 = vmatpush.bf16.msra.mxu3 %v2133_v30 }
  0xd9   :  { %661 = vmatpush.bf16.msra.mxu2 %v2058_v5  ;;  %629 = vmatpush.bf16.msra.mxu0 %v2220_v51 }
  0xdd   :  { %630 = vmatpush.bf16.msra.mxu0 %v2226_v52 }
  0xe1   :  { %631 = vmatpush.bf16.msra.mxu0 %v2233_v53 }
  0xe4   :  { %1654 = vmatmul.msk.bf16.vlgmr.msrb.gmra.mxu2 %vm142_vm0, %v346_v23 }
  0xe5   :  { %739 = vmatpush.bf16.msrb.mxu2 %v2079_v10 }
  0xe9   :  { %740 = vmatpush.bf16.msrb.mxu2 %v2094_v14 }
 0x141   :  { %v2167_v6 = vpop.f32.mrf.mxu0 }
 0x147   :  { %v374_v25 = vpop.f32.mrf.mxu2 }
 0x148   :  { %v375_v26 = vadd.f32 %v2172_v24, %v374_v25 }
 0x149   :  { %v470_v27 = vpop.f32.mrf.mxu0 }
 0x14a   :  { %380 = vst [vmem:[#allocation8] sm:$0x3] %v375_v26  ;;  %v381_v31 = vmul.f32 2.0, %v375_v26 }
 0x14c   :  { %v383_v32 = vadd.f32 %v382_v29, %v381_v31 }
 0x14e   :  { %v385_v33 = vsel %vm384_vm10, %v383_v32, -inf }
 0x14f   :  { %v376_v34 = vpop.f32.mrf.mxu2  ;;  %386 = vmax.xlane.f32.xlu0 %v385_v33 }
 0x157   :  { %v517_v35 = vpop.f32.mrf.mxu2 }
 0x15f   :  { %v519_v36 = vpop.f32.mrf.mxu2 }
 0x167   :  { %v2179_v37 = vpop.f32.mrf.mxu2 }
 0x16f   :  { %v578_v38 = vpop.f32.mrf.mxu2 }
 0x1c2   :  { %v387_v45 = vpop.xlane.xlu0 %386 }
 0x1c3   :  { %v388_v46 = vsub.f32 %v383_v32, %v387_v45 }
 0x1c5   :  { %v389_v47 = vmul.f32 1.442695, %v388_v46 }
 0x1c7   :  { %1751 = vpow2.f32 %v389_v47 }
 0x1cd   :  { %v1752_v49 = vpop.eup %1751 }
 0x1ce   :  { %v391_v50 = vsel %vm384_vm10, %v1752_v49, 0.0 }
 0x1cf   :  { %392 = vadd.xlane.f32.xlu0 %v391_v50 }
 0x242   :  { %v393_v54 = vpop.xlane.xlu0 %392 }
 0x243   :  { %1753 = vrcp.f32 %v393_v54  ;;  %v577_v54 = vadd.f32 %v2141_v44, %v2179_v37 }
 0x249   :  { %v1754_v55 = vpop.eup %1753 }
 0x24a   :  { %v395_v56 = vmul.f32 %v1754_v55, %v1752_v49 }
 0x24c   :  { %v396_v57 = vpack.c.bf16 %v395_v56, %v395_v56 }
 0x24e   :  { %453 = vmatmul.bf16.vlgmr.msrb.gmra.mxu3 %v396_v57 }
 0x24f   :  { %693 = vmatpush.bf16.msrb.mxu3 %v2044_v2 }
 0x253   :  { %694 = vmatpush.bf16.msrb.mxu3 %v2067_v7 }
 0x2d1   :  { %v454_v58 = vpop.f32.mrf.mxu3 }
 0x2d2   :  { %v458_v59 = vpack.c.bf16 %v454_v58, %v454_v58 }
 0x2d4   :  { %1648 = vmatmul.msk.bf16.vlgmr.msra.gmra.mxu1 %vm142_vm0, %v458_v59  ;;  %1651 = vmatmul.msk.bf16.vlgmr.msrb.gmra.mxu0 %vm142_vm0, %v458_v59 }
 0x2d5   :  { %644 = vmatpush.bf16.msra.mxu1 %v2037_v0  ;;  %776 = vmatpush.bf16.msrb.mxu0 %v2127_v28 }
 0x2d9   :  { %v456_v60 = vpop.f32.mrf.mxu3  ;;  %645 = vmatpush.bf16.msra.mxu1 %v2053_v4  ;;  %777 = vmatpush.bf16.msrb.mxu0 %v2133_v30 }
 0x2e4   :  { %1653 = vmatmul.msk.bf16.vlgmr.msrb.gmra.mxu1 %vm142_vm0, %v458_v59 }
 0x2e5   :  { %706 = vmatpush.bf16.msrb.mxu1 %v2049_v3 }
 0x2e9   :  { %707 = vmatpush.bf16.msrb.mxu1 %v2072_v8 }
 0x351   :  { %v484_v61 = vpop.f32.mrf.mxu1  ;;  %v530_v62 = vpop.f32.mrf.mxu0 }
 0x352   :  { %v485_v63 = vadd.f32 %v484_v61, %v2167_v6  ;;  %v531_v11 = vadd.f32 %v530_v62, %v517_v35 }
 0x354   :  { %v488_v12 = vadd.f32 %v2115_v15, %v485_v63  ;;  %v534_v16 = vadd.f32 %v2121_v21, %v531_v11 }
 0x356   :  { %v1649_v17 = vmul.f32 -1.442695, %v488_v12  ;;  %v1652_v18 = vmul.f32 -1.442695, %v534_v16 }
 0x358   :  { %1755 = vpow2.f32 %v1649_v17 }
 0x359   :  { %1757 = vpow2.f32 %v1652_v18  ;;  %v486_v19 = vpop.f32.mrf.mxu1  ;;  %v532_v20 = vpop.f32.mrf.mxu0 }
 0x35e   :  { %v1756_v23 = vpop.eup %1755 }
 0x35f   :  { %v1758_v25 = vpop.eup %1757  ;;  %v492_v26 = vadd.f32 1.0, %v1756_v23 }
 0x360   :  { %v538_v27 = vadd.f32 1.0, %v1758_v25 }
 0x361   :  { %1759 = vrcp.f32 %v492_v26  ;;  %v563_v29 = vpop.f32.mrf.mxu1  ;;  %v504_v38 = vand.u32 2147483648, %v492_v26  ;;  %v502_v46 = vand.u32 2147483647, %v492_v26  ;;  %vm498_vm12 = vweird.f32 %v492_v26 }
 0x362   :  { %1761 = vrcp.f32 %v538_v27  ;;  %v550_v58 = vand.u32 2147483648, %v538_v27  ;;  %v564_v59 = vadd.f32 %v2146_v48, %v563_v29  ;;  %vm544_vm1 = vweird.f32 %v538_v27 }
 0x363   :  { %v505_v50 = vor.u32 1.1754944e-38, %v504_v38  ;;  %vm503_vm14 = vcmp.eq.f32.partialorder %v502_v46, 8.507059e+37  ;;  %v548_v61 = vand.u32 2147483647, %v538_v27 }
 0x364   :  { %v551_v11 = vor.u32 1.1754944e-38, %v550_v58 }
 0x365   :  { %vm549_vm3 = vcmp.eq.f32.partialorder %v548_v61, 8.507059e+37 }
 0x367   :  { %v1760_v31 = vpop.eup %1759 }
 0x368   :  { %v1762_v6 = vpop.eup %1761  ;;  %v494_v32 = vmul.f32 %v1760_v31, %v492_v26  ;;  %vm499_vm11 = vweird.f32 %v1760_v31 }
 0x369   :  { %v540_v33 = vmul.f32 %v1762_v6, %v538_v27  ;;  %v565_v34 = vpop.f32.mrf.mxu1  ;;  %vm500_vm13 = vmor %vm498_vm12, %vm499_vm11  ;;  %vm545_vm15 = vweird.f32 %v1762_v6  ;;  %v1656_v27 = vld [vmem:[%s2561_s10 + $0x2] sm:$0x3] }
 0x36a   :  { %v495_v35 = vsub.f32 1.0, %v494_v32  ;;  %vm546_vm2 = vmor %vm544_vm1, %vm545_vm15 }
 0x36b   :  { %v541_v36 = vsub.f32 1.0, %v540_v33 }
 0x36c   :  { %v496_v45 = vmul.f32 %v1760_v31, %v495_v35 }
 0x36d   :  { %v542_v47 = vmul.f32 %v1762_v6, %v541_v36 }
 0x36e   :  { %v497_v49 = vadd.f32 %v1760_v31, %v496_v45 }
 0x36f   :  { %v543_v57 = vadd.f32 %v1762_v6, %v542_v47 }
 0x370   :  { %v501_v55 = vsel %vm500_vm13, %v1760_v31, %v497_v49 }
 0x371   :  { %v506_v56 = vsel %vm503_vm14, %v505_v50, %v501_v55  ;;  %v547_v63 = vsel %vm546_vm2, %v1762_v6, %v543_v57 }
 0x372   :  { %v580_v60 = vmul.f32 %v577_v54, %v506_v56  ;;  %v552_v12 = vsel %vm549_vm3, %v551_v11, %v547_v63 }
 0x373   :  { %v583_v16 = vsub.f32 1.0, %v552_v12  ;;  %v585_v18 = vmul.f32 %v552_v12, %v2151_v22 }
 0x374   :  { %v581_v62 = vadd.f32 %v580_v60, %v564_v59 }
 0x376   :  { %1763 = vtanh.f32 %v581_v62 }
 0x37c   :  { %v1764_v37 = vpop.eup %1763 }
 0x37d   :  { %v584_v17 = vmul.f32 %v1764_v37, %v583_v16 }
 0x37f   :  { %v2258_v19 = vadd.f32 %v585_v18, %v584_v17 }
 0x381   :  { %605 = vst.msk [vmem:[#allocation7 + $0x2] sm:$0x3] %vm378_vm9, %v2258_v19  ;;  %v587_v20 = vpack.c.bf16 %v2258_v19, %v2258_v19 }
 0x383   :  { %1655 = vmatmul.msk.bf16.vlgmr.msra.gmra.mxu3 %vm142_vm0, %v587_v20  ;;  %1657 = vmatmul.msk.bf16.vlgmr.msra.gmra.mxu1 %vm142_vm0, %v587_v20 }
 0x384   :  { %752 = vmatpush.bf16.msra.mxu3 %v2074_v9  ;;  %803 = vmatpush.bf16.msra.mxu1 %v2184_v39 }
 0x388   :  { %753 = vmatpush.bf16.msra.mxu3 %v2089_v13  ;;  %804 = vmatpush.bf16.msra.mxu1 %v2190_v40 }
 0x38c   :  { %805 = vmatpush.bf16.msra.mxu1 %v2197_v41 }
 0x390   :  { %806 = vmatpush.bf16.msra.mxu1 %v2204_v42 }
 0x393   :  { %1660 = vmatmul.msk.bf16.vlgmr.msrb.gmra.mxu3 %vm142_vm0, %v587_v20 }
 0x394   :  { %807 = vmatpush.bf16.msra.mxu1 %v2211_v43  ;;  %839 = vmatpush.bf16.msrb.mxu3 %v2042_v1 }
 0x398   :  { %808 = vmatpush.bf16.msra.mxu1 %v2220_v51  ;;  %840 = vmatpush.bf16.msrb.mxu3 %v2058_v5 }
 0x39c   :  { %809 = vmatpush.bf16.msra.mxu1 %v2226_v52 }
 0x3a0   :  { %810 = vmatpush.bf16.msra.mxu1 %v2233_v53 }
 0x3a3   :  { %1664 = vmatmul.msk.bf16.vlgmr.msra.gmra.mxu3 %vm142_vm0, %v587_v20 }
 0x3a4   :  { %918 = vmatpush.bf16.msra.mxu3 %v2079_v10 }
 0x3a8   :  { %919 = vmatpush.bf16.msra.mxu3 %v2094_v14 }
 0x400   :  { %v647_v22 = vpop.f32.mrf.mxu1 }
 0x406   :  { %v600_v23 = vpop.f32.mrf.mxu3 }
 0x407   :  { %v601_v25 = vadd.f32 %v2172_v24, %v600_v23 }
 0x408   :  { %v649_v26 = vpop.f32.mrf.mxu1 }
 0x409   :  { %607 = vst [vmem:[#allocation8 + $0x2] sm:$0x3] %v601_v25  ;;  %v608_v29 = vmul.f32 2.0, %v601_v25 }
 0x40b   :  { %v611_v31 = vadd.f32 %v1656_v27, %v608_v29 }
 0x40d   :  { %v612_v6 = vsel %vm384_vm10, %v611_v31, -inf }
 0x40e   :  { %v602_v32 = vpop.f32.mrf.mxu3  ;;  %613 = vmax.xlane.f32.xlu1 %v612_v6 }
 0x416   :  { %v696_v33 = vpop.f32.mrf.mxu3 }
 0x41e   :  { %v698_v34 = vpop.f32.mrf.mxu3 }
 0x426   :  { %v2287_v35 = vpop.f32.mrf.mxu3 }
 0x42e   :  { %v757_v36 = vpop.f32.mrf.mxu3 }
 0x481   :  { %v614_v38 = vpop.xlane.xlu1 %613 }
 0x482   :  { %v615_v45 = vsub.f32 %v611_v31, %v614_v38 }
 0x484   :  { %v616_v46 = vmul.f32 1.442695, %v615_v45 }
 0x486   :  { %1765 = vpow2.f32 %v616_v46 }
 0x48c   :  { %v1766_v47 = vpop.eup %1765 }
 0x48d   :  { %v618_v49 = vsel %vm384_vm10, %v1766_v47, 0.0 }
 0x48e   :  { %619 = vadd.xlane.f32.xlu1 %v618_v49 }
 0x501   :  { %v620_v50 = vpop.xlane.xlu1 %619 }
 0x502   :  { %1767 = vrcp.f32 %v620_v50  ;;  %v756_v50 = vadd.f32 %v2141_v44, %v2287_v35 }
 0x508   :  { %v1768_v54 = vpop.eup %1767 }
 0x509   :  { %v622_v55 = vmul.f32 %v1768_v54, %v1766_v47 }
 0x50b   :  { %v623_v56 = vpack.c.bf16 %v622_v55, %v622_v55 }
 0x50d   :  { %632 = vmatmul.bf16.vlgmr.msra.gmra.mxu0 %v623_v56 }
 0x50e   :  { %872 = vmatpush.bf16.msra.mxu0 %v2044_v2 }
 0x512   :  { %873 = vmatpush.bf16.msra.mxu0 %v2067_v7 }
 0x58a   :  { %v633_v57 = vpop.f32.mrf.mxu0 }
 0x58b   :  { %v637_v58 = vpack.c.bf16 %v633_v57, %v633_v57 }
 0x58d   :  { %1658 = vmatmul.msk.bf16.vlgmr.msra.gmra.mxu2 %vm142_vm0, %v637_v58  ;;  %1661 = vmatmul.msk.bf16.vlgmr.msrb.gmra.mxu1 %vm142_vm0, %v637_v58 }
 0x58e   :  { %823 = vmatpush.bf16.msra.mxu2 %v2037_v0  ;;  %955 = vmatpush.bf16.msrb.mxu1 %v2127_v28 }
 0x592   :  { %v635_v59 = vpop.f32.mrf.mxu0  ;;  %824 = vmatpush.bf16.msra.mxu2 %v2053_v4  ;;  %956 = vmatpush.bf16.msrb.mxu1 %v2133_v30 }
 0x59d   :  { %1663 = vmatmul.msk.bf16.vlgmr.msrb.gmra.mxu2 %vm142_vm0, %v637_v58 }
 0x59e   :  { %885 = vmatpush.bf16.msrb.mxu2 %v2049_v3 }
 0x5a2   :  { %886 = vmatpush.bf16.msrb.mxu2 %v2072_v8 }
 0x60a   :  { %v709_v60 = vpop.f32.mrf.mxu1 }
 0x60b   :  { %v710_v61 = vadd.f32 %v709_v60, %v696_v33 }
 0x60d   :  { %v713_v62 = vadd.f32 %v2121_v21, %v710_v61 }
 0x60f   :  { %v1662_v63 = vmul.f32 -1.442695, %v713_v62 }
 0x610   :  { %v663_v11 = vpop.f32.mrf.mxu2 }
 0x611   :  { %1769 = vpow2.f32 %v1662_v63  ;;  %v664_v12 = vadd.f32 %v663_v11, %v647_v22 }
 0x612   :  { %v711_v16 = vpop.f32.mrf.mxu1 }
 0x613   :  { %v667_v37 = vadd.f32 %v2115_v15, %v664_v12 }
 0x615   :  { %v1659_v17 = vmul.f32 -1.442695, %v667_v37 }
 0x617   :  { %v1770_v18 = vpop.eup %1769  ;;  %1771 = vpow2.f32 %v1659_v17 }
 0x618   :  { %v717_v20 = vadd.f32 1.0, %v1770_v18  ;;  %v665_v23 = vpop.f32.mrf.mxu2 }
 0x61a   :  { %1773 = vrcp.f32 %v717_v20  ;;  %v729_v57 = vand.u32 2147483648, %v717_v20  ;;  %vm723_vm11 = vweird.f32 %v717_v20  ;;  %v727_v60 = vand.u32 2147483647, %v717_v20 }
 0x61c   :  { %v730_v63 = vor.u32 1.1754944e-38, %v729_v57  ;;  %vm728_vm13 = vcmp.eq.f32.partialorder %v727_v60, 8.507059e+37 }
 0x61d   :  { %v1772_v25 = vpop.eup %1771 }
 0x61e   :  { %v671_v26 = vadd.f32 1.0, %v1772_v25 }
 0x620   :  { %1775 = vrcp.f32 %v671_v26  ;;  %v742_v27 = vpop.f32.mrf.mxu2  ;;  %v1774_v29 = vpop.eup %1773  ;;  %v683_v36 = vand.u32 2147483648, %v671_v26  ;;  %v681_v45 = vand.u32 2147483647, %v671_v26  ;;  %vm677_vm5 = vweird.f32 %v671_v26 }
 0x621   :  { %v719_v31 = vmul.f32 %v1774_v29, %v717_v20  ;;  %vm724_vm8 = vweird.f32 %v1774_v29  ;;  %v743_v58 = vadd.f32 %v2146_v48, %v742_v27 }
 0x622   :  { %v684_v49 = vor.u32 1.1754944e-38, %v683_v36  ;;  %vm682_vm7 = vcmp.eq.f32.partialorder %v681_v45, 8.507059e+37  ;;  %vm725_vm12 = vmor %vm723_vm11, %vm724_vm8 }
 0x623   :  { %v720_v33 = vsub.f32 1.0, %v719_v31 }
 0x625   :  { %v721_v46 = vmul.f32 %v1774_v29, %v720_v33 }
 0x626   :  { %v1776_v6 = vpop.eup %1775 }
 0x627   :  { %v673_v32 = vmul.f32 %v1776_v6, %v671_v26  ;;  %vm678_vm4 = vweird.f32 %v1776_v6  ;;  %v722_v56 = vadd.f32 %v1774_v29, %v721_v46 }
 0x628   :  { %v744_v34 = vpop.f32.mrf.mxu2  ;;  %vm679_vm6 = vmor %vm677_vm5, %vm678_vm4 }
 0x629   :  { %v674_v22 = vsub.f32 1.0, %v673_v32  ;;  %v726_v62 = vsel %vm725_vm12, %v1774_v29, %v722_v56 }
 0x62a   :  { %v731_v11 = vsel %vm728_vm13, %v730_v63, %v726_v62 }
 0x62b   :  { %v675_v38 = vmul.f32 %v1776_v6, %v674_v22  ;;  %v762_v12 = vsub.f32 1.0, %v731_v11  ;;  %v764_v37 = vmul.f32 %v731_v11, %v2258_v19 }
 0x62d   :  { %v676_v47 = vadd.f32 %v1776_v6, %v675_v38 }
 0x62f   :  { %v680_v54 = vsel %vm679_vm6, %v1776_v6, %v676_v47 }
 0x630   :  { %v685_v55 = vsel %vm682_vm7, %v684_v49, %v680_v54 }
 0x631   :  { %v759_v59 = vmul.f32 %v756_v50, %v685_v55 }
 0x633   :  { %v760_v61 = vadd.f32 %v759_v59, %v743_v58 }
 0x635   :  { %1777 = vtanh.f32 %v760_v61 }
 0x63b   :  { %v1778_v35 = vpop.eup %1777 }
 0x63c   :  { %v763_v16 = vmul.f32 %v1778_v35, %v762_v12 }
 0x63e   :  { %v2307_v17 = vadd.f32 %v764_v37, %v763_v16 }
 0x640   :  { %784 = vst.msk [vmem:[#allocation7 + $0x4] sm:$0x3] %vm378_vm9, %v2307_v17  ;;  %v766_v18 = vpack.c.bf16 %v2307_v17, %v2307_v17 }
 0x642   :  { %1665 = vmatmul.msk.bf16.vlgmr.msrb.gmra.mxu0 %vm142_vm0, %v766_v18  ;;  %1667 = vmatmul.msk.bf16.vlgmr.msra.gmra.mxu2 %vm142_vm0, %v766_v18 }
 0x643   :  { %931 = vmatpush.bf16.msrb.mxu0 %v2074_v9  ;;  %982 = vmatpush.bf16.msra.mxu2 %v2184_v39 }
 0x647   :  { %932 = vmatpush.bf16.msrb.mxu0 %v2089_v13  ;;  %983 = vmatpush.bf16.msra.mxu2 %v2190_v40 }
 0x64b   :  { %984 = vmatpush.bf16.msra.mxu2 %v2197_v41 }
 0x64f   :  { %985 = vmatpush.bf16.msra.mxu2 %v2204_v42 }
 0x652   :  { %1670 = vmatmul.msk.bf16.vlgmr.msra.gmra.mxu0 %vm142_vm0, %v766_v18 }
 0x653   :  { %986 = vmatpush.bf16.msra.mxu2 %v2211_v43  ;;  %1018 = vmatpush.bf16.msra.mxu0 %v2042_v1  ;;  %v1666_v1 = vld [vmem:[%s2561_s10 + $0x4] sm:$0x3] }
 0x657   :  { %987 = vmatpush.bf16.msra.mxu2 %v2220_v51  ;;  %1019 = vmatpush.bf16.msra.mxu0 %v2058_v5 }
 0x65b   :  { %988 = vmatpush.bf16.msra.mxu2 %v2226_v52 }
 0x65f   :  { %989 = vmatpush.bf16.msra.mxu2 %v2233_v53 }
 0x662   :  { %1674 = vmatmul.msk.bf16.vlgmr.msrb.gmra.mxu0 %vm142_vm0, %v766_v18 }
 0x663   :  { %1097 = vmatpush.bf16.msrb.mxu0 %v2079_v10 }
 0x667   :  { %1098 = vmatpush.bf16.msrb.mxu0 %v2094_v14 }
 0x6bf   :  { %v779_v19 = vpop.f32.mrf.mxu0 }
 0x6c0   :  { %v780_v20 = vadd.f32 %v2172_v24, %v779_v19 }
 0x6c2   :  { %786 = vst [vmem:[#allocation8 + $0x4] sm:$0x3] %v780_v20  ;;  %v787_v23 = vmul.f32 2.0, %v780_v20 }
 0x6c4   :  { %v790_v25 = vadd.f32 %v1666_v1, %v787_v23 }
 0x6c5   :  { %v826_v26 = vpop.f32.mrf.mxu2 }
 0x6c6   :  { %v791_v27 = vsel %vm384_vm10, %v790_v25, -inf }
 0x6c7   :  { %v781_v29 = vpop.f32.mrf.mxu0  ;;  %792 = vmax.xlane.f32.xlu2 %v791_v27 }
 0x6cd   :  { %v828_v31 = vpop.f32.mrf.mxu2 }
 0x6cf   :  { %v875_v6 = vpop.f32.mrf.mxu0 }
 0x6d7   :  { %v877_v32 = vpop.f32.mrf.mxu0 }
 0x6df   :  { %v2336_v33 = vpop.f32.mrf.mxu0 }
 0x6e0   :  { %v935_v31 = vadd.f32 %v2141_v44, %v2336_v33 }
 0x6e7   :  { %v936_v34 = vpop.f32.mrf.mxu0 }
 0x73a   :  { %v793_v22 = vpop.xlane.xlu2 %792 }
 0x73b   :  { %v794_v36 = vsub.f32 %v790_v25, %v793_v22 }
 0x73d   :  { %v795_v38 = vmul.f32 1.442695, %v794_v36 }
 0x73f   :  { %1779 = vpow2.f32 %v795_v38 }
 0x745   :  { %v1780_v45 = vpop.eup %1779 }
 0x746   :  { %v797_v46 = vsel %vm384_vm10, %v1780_v45, 0.0 }
 0x747   :  { %798 = vadd.xlane.f32.xlu2 %v797_v46 }
 0x7ba   :  { %v799_v47 = vpop.xlane.xlu2 %798 }
 0x7bb   :  { %1781 = vrcp.f32 %v799_v47 }
 0x7c1   :  { %v1782_v49 = vpop.eup %1781 }
 0x7c2   :  { %v801_v50 = vmul.f32 %v1782_v49, %v1780_v45 }
 0x7c4   :  { %v802_v54 = vpack.c.bf16 %v801_v50, %v801_v50 }
 0x7c6   :  { %811 = vmatmul.bf16.vlgmr.msra.gmra.mxu1 %v802_v54 }
 0x7c7   :  { %1051 = vmatpush.bf16.msra.mxu1 %v2044_v2 }
 0x7cb   :  { %1052 = vmatpush.bf16.msra.mxu1 %v2067_v7 }
 0x843   :  { %v812_v55 = vpop.f32.mrf.mxu1 }
 0x844   :  { %v816_v56 = vpack.c.bf16 %v812_v55, %v812_v55 }
 0x846   :  { %1668 = vmatmul.msk.bf16.vlgmr.msrb.gmra.mxu3 %vm142_vm0, %v816_v56  ;;  %1671 = vmatmul.msk.bf16.vlgmr.msrb.gmra.mxu2 %vm142_vm0, %v816_v56 }
 0x847   :  { %1002 = vmatpush.bf16.msrb.mxu3 %v2037_v0  ;;  %1134 = vmatpush.bf16.msrb.mxu2 %v2127_v28 }
 0x84b   :  { %v814_v57 = vpop.f32.mrf.mxu1  ;;  %1003 = vmatpush.bf16.msrb.mxu3 %v2053_v4  ;;  %1135 = vmatpush.bf16.msrb.mxu2 %v2133_v30 }
 0x84c   :  { %v1676_v57 = vld [vmem:[%s2561_s10 + $0x6] sm:$0x3] }
 0x856   :  { %1673 = vmatmul.msk.bf16.vlgmr.msra.gmra.mxu3 %vm142_vm0, %v816_v56 }
 0x857   :  { %1064 = vmatpush.bf16.msra.mxu3 %v2049_v3 }
 0x85b   :  { %1065 = vmatpush.bf16.msra.mxu3 %v2072_v8 }
 0x8c9   :  { %v842_v2 = vpop.f32.mrf.mxu3  ;;  %v888_v7 = vpop.f32.mrf.mxu2 }
 0x8ca   :  { %v843_v58 = vadd.f32 %v842_v2, %v826_v26  ;;  %v889_v59 = vadd.f32 %v888_v7, %v875_v6 }
 0x8cc   :  { %v846_v60 = vadd.f32 %v2115_v15, %v843_v58  ;;  %v892_v0 = vadd.f32 %v2121_v21, %v889_v59 }
 0x8ce   :  { %v1669_v61 = vmul.f32 -1.442695, %v846_v60  ;;  %v1672_v62 = vmul.f32 -1.442695, %v892_v0 }
 0x8d0   :  { %1783 = vpow2.f32 %v1669_v61 }
 0x8d1   :  { %1785 = vpow2.f32 %v1672_v62  ;;  %v844_v4 = vpop.f32.mrf.mxu3  ;;  %v890_v63 = vpop.f32.mrf.mxu2 }
 0x8d6   :  { %v1784_v11 = vpop.eup %1783 }
 0x8d7   :  { %v1786_v12 = vpop.eup %1785  ;;  %v850_v35 = vadd.f32 1.0, %v1784_v11 }
 0x8d8   :  { %v896_v3 = vadd.f32 1.0, %v1786_v12 }
 0x8d9   :  { %1787 = vrcp.f32 %v850_v35  ;;  %v921_v8 = vpop.f32.mrf.mxu3  ;;  %v862_v1 = vand.u32 2147483648, %v850_v35  ;;  %v860_v25 = vand.u32 2147483647, %v850_v35  ;;  %vm856_vm15 = vweird.f32 %v850_v35 }
 0x8da   :  { %1789 = vrcp.f32 %v896_v3  ;;  %v908_v22 = vand.u32 2147483648, %v896_v3  ;;  %v922_v36 = vadd.f32 %v2146_v48, %v921_v8  ;;  %vm902_vm4 = vweird.f32 %v896_v3 }
 0x8db   :  { %v863_v29 = vor.u32 1.1754944e-38, %v862_v1  ;;  %vm861_vm2 = vcmp.eq.f32.partialorder %v860_v25, 8.507059e+37  ;;  %v906_v45 = vand.u32 2147483647, %v896_v3  ;;  %v2405_v1 = vld [vmem:[#allocation5] sm:$0xff] }
 0x8dc   :  { %v909_v49 = vor.u32 1.1754944e-38, %v908_v22 }
 0x8dd   :  { %vm907_vm6 = vcmp.eq.f32.partialorder %v906_v45, 8.507059e+37 }
 0x8df   :  { %v1788_v16 = vpop.eup %1787 }
 0x8e0   :  { %v1790_v37 = vpop.eup %1789  ;;  %v852_v18 = vmul.f32 %v1788_v16, %v850_v35  ;;  %vm857_vm14 = vweird.f32 %v1788_v16 }
 0x8e1   :  { %v898_v19 = vmul.f32 %v1790_v37, %v896_v3  ;;  %v923_v15 = vpop.f32.mrf.mxu3  ;;  %vm858_vm1 = vmor %vm856_vm15, %vm857_vm14  ;;  %vm903_vm3 = vweird.f32 %v1790_v37 }
 0x8e2   :  { %v853_v20 = vsub.f32 1.0, %v852_v18  ;;  %vm904_vm5 = vmor %vm902_vm4, %vm903_vm3  ;;  %v2396_v18 = vld [vmem:[#allocation5 + $0x10] sm:$0xff] }
 0x8e3   :  { %v899_v21 = vsub.f32 1.0, %v898_v19 }
 0x8e4   :  { %v854_v23 = vmul.f32 %v1788_v16, %v853_v20  ;;  %v2401_v20 = vld [vmem:[#allocation5 + $0x8] sm:$0xff] }
 0x8e5   :  { %v900_v26 = vmul.f32 %v1790_v37, %v899_v21 }
 0x8e6   :  { %v855_v27 = vadd.f32 %v1788_v16, %v854_v23  ;;  %v2413_v23 = vld [vmem:[%s2553_s2 + $0x18] sm:$0xff] }
 0x8e7   :  { %v901_v34 = vadd.f32 %v1790_v37, %v900_v26 }
 0x8e8   :  { %v859_v6 = vsel %vm858_vm1, %v1788_v16, %v855_v27 }
 0x8e9   :  { %v864_v32 = vsel %vm861_vm2, %v863_v29, %v859_v6  ;;  %v905_v47 = vsel %vm904_vm5, %v1790_v37, %v901_v34  ;;  %v2393_v37 = vld [vmem:[#allocation5 + $0x18] sm:$0xff] }
 0x8ea   :  { %v938_v38 = vmul.f32 %v935_v31, %v864_v32  ;;  %v910_v50 = vsel %vm907_vm6, %v909_v49, %v905_v47  ;;  %v2431_v34 = vld [vmem:[%s2555_s4 + $0x1] ss:$0 sm:$0xff] }
 0x8eb   :  { %v941_v54 = vsub.f32 1.0, %v910_v50  ;;  %v943_v55 = vmul.f32 %v910_v50, %v2307_v17  ;;  %v2375_v17 = vld [vmem:[%s2553_s2 + $0x8] sm:$0xff] }
 0x8ec   :  { %v939_v46 = vadd.f32 %v938_v38, %v922_v36 }
 0x8ee   :  { %1791 = vtanh.f32 %v939_v46 }
 0x8f4   :  { %v1792_v44 = vpop.eup %1791 }
 0x8f5   :  { %v942_v33 = vmul.f32 %v1792_v44, %v941_v54 }
 0x8f7   :  { %v2356_v56 = vadd.f32 %v943_v55, %v942_v33 }
 0x8f9   :  { %963 = vst.msk [vmem:[#allocation7 + $0x6] sm:$0x3] %vm378_vm9, %v2356_v56  ;;  %v945_v48 = vpack.c.bf16 %v2356_v56, %v2356_v56 }
 0x8fb   :  { %1675 = vmatmul.msk.bf16.vlgmr.msrb.gmra.mxu1 %vm142_vm0, %v945_v48  ;;  %1677 = vmatmul.msk.bf16.vlgmr.msrb.gmra.mxu3 %vm142_vm0, %v945_v48 }
 0x8fc   :  { %1110 = vmatpush.bf16.msrb.mxu1 %v2074_v9  ;;  %1161 = vmatpush.bf16.msrb.mxu3 %v2184_v39 }
 0x900   :  { %1111 = vmatpush.bf16.msrb.mxu1 %v2089_v13  ;;  %1162 = vmatpush.bf16.msrb.mxu3 %v2190_v40 }
 0x904   :  { %1163 = vmatpush.bf16.msrb.mxu3 %v2197_v41 }
 0x908   :  { %1164 = vmatpush.bf16.msrb.mxu3 %v2204_v42 }
 0x90b   :  { %1680 = vmatmul.msk.bf16.vlgmr.msra.gmra.mxu1 %vm142_vm0, %v945_v48 }
 0x90c   :  { %1165 = vmatpush.bf16.msrb.mxu3 %v2211_v43  ;;  %1197 = vmatpush.bf16.msra.mxu1 %v2375_v17 }
 0x910   :  { %1166 = vmatpush.bf16.msrb.mxu3 %v2220_v51  ;;  %1198 = vmatpush.bf16.msra.mxu1 %v2058_v5 }
 0x914   :  { %1167 = vmatpush.bf16.msrb.mxu3 %v2226_v52 }
 0x918   :  { %1168 = vmatpush.bf16.msrb.mxu3 %v2233_v53 }
 0x91b   :  { %1684 = vmatmul.msk.bf16.vlgmr.msrb.gmra.mxu1 %vm142_vm0, %v945_v48 }
 0x91c   :  { %1276 = vmatpush.bf16.msrb.mxu1 %v2079_v10 }
 0x920   :  { %1277 = vmatpush.bf16.msrb.mxu1 %v2094_v14 }
 0x978   :  { %v958_v9 = vpop.f32.mrf.mxu1 }
 0x979   :  { %v959_v13 = vadd.f32 %v2172_v24, %v958_v9 }
 0x97b   :  { %965 = vst [vmem:[#allocation8 + $0x6] sm:$0x3] %v959_v13  ;;  %v966_v2 = vmul.f32 2.0, %v959_v13 }
 0x97d   :  { %v969_v5 = vadd.f32 %v1676_v57, %v966_v2 }
 0x97e   :  { %v1005_v7 = vpop.f32.mrf.mxu3 }
 0x97f   :  { %v970_v58 = vsel %vm384_vm10, %v969_v5, -inf }
 0x980   :  { %v960_v59 = vpop.f32.mrf.mxu1  ;;  %971 = vmax.xlane.f32.xlu0 %v970_v58  ;;  %v2437_v58 = vld [vmem:[%s2557_s6] ss:$0 sm:$0xff] }
 0x986   :  { %v1007_v60 = vpop.f32.mrf.mxu3 }
 0x988   :  { %v1054_v0 = vpop.f32.mrf.mxu1 }
 0x990   :  { %v1056_v10 = vpop.f32.mrf.mxu1 }
 0x998   :  { %v2390_v61 = vpop.f32.mrf.mxu1 }
 0x999   :  { %v1114_v59 = vadd.f32 %v2437_v58, %v2390_v61 }
 0x9a0   :  { %v1115_v14 = vpop.f32.mrf.mxu1 }
 0x9a1   :  { %v2444_v14 = vld [vmem:[%s2556_s5] ss:$0 sm:$0xff] }
 0x9f3   :  { %v972_v62 = vpop.xlane.xlu0 %971 }
 0x9f4   :  { %v973_v4 = vsub.f32 %v969_v5, %v972_v62 }
 0x9f6   :  { %v974_v63 = vmul.f32 1.442695, %v973_v4 }
 0x9f8   :  { %1793 = vpow2.f32 %v974_v63 }
 0x9fe   :  { %v1794_v11 = vpop.eup %1793 }
 0x9ff   :  { %v976_v12 = vsel %vm384_vm10, %v1794_v11, 0.0 }
 0xa00   :  { %977 = vadd.xlane.f32.xlu1 %v976_v12 }
 0xa73   :  { %v978_v35 = vpop.xlane.xlu1 %977 }
 0xa74   :  { %1795 = vrcp.f32 %v978_v35 }
 0xa7a   :  { %v1796_v3 = vpop.eup %1795 }
 0xa7b   :  { %v980_v8 = vmul.f32 %v1796_v3, %v1794_v11 }
 0xa7d   :  { %v981_v16 = vpack.c.bf16 %v980_v8, %v980_v8 }
 0xa7f   :  { %990 = vmatmul.bf16.vlgmr.msra.gmra.mxu2 %v981_v16 }
 0xa80   :  { %1230 = vmatpush.bf16.msra.mxu2 %v2393_v37 }
 0xa84   :  { %1231 = vmatpush.bf16.msra.mxu2 %v2396_v18 }
 0xb02   :  { %v991_v19 = vpop.f32.mrf.mxu2 }
 0xb03   :  { %v995_v15 = vpack.c.bf16 %v991_v19, %v991_v19 }
 0xb05   :  { %1678 = vmatmul.msk.bf16.vlgmr.msra.gmra.mxu0 %vm142_vm0, %v995_v15  ;;  %1681 = vmatmul.msk.bf16.vlgmr.msra.gmra.mxu3 %vm142_vm0, %v995_v15 }
 0xb06   :  { %1181 = vmatpush.bf16.msra.mxu0 %v2401_v20  ;;  %1313 = vmatpush.bf16.msra.mxu3 %v2127_v28  ;;  %v2419_v28 = vld [vmem:[%s2553_s2 + $0x10] sm:$0xff] }
 0xb0a   :  { %v993_v21 = vpop.f32.mrf.mxu2  ;;  %1182 = vmatpush.bf16.msra.mxu0 %v2405_v1  ;;  %1314 = vmatpush.bf16.msra.mxu3 %v2133_v30  ;;  %v2425_v30 = vld [vmem:[%s2555_s4] ss:$0 sm:$0xff] }
 0xb15   :  { %1683 = vmatmul.msk.bf16.vlgmr.msrb.gmra.mxu0 %vm142_vm0, %v995_v15 }
 0xb16   :  { %1243 = vmatpush.bf16.msrb.mxu0 %v2413_v23 }
 0xb1a   :  { %1244 = vmatpush.bf16.msrb.mxu0 %v2419_v28 }
 0xb82   :  { %v1021_v25 = vpop.f32.mrf.mxu0 }
 0xb83   :  { %v1022_v26 = vadd.f32 %v1021_v25, %v1005_v7 }
 0xb85   :  { %v1025_v27 = vadd.f32 %v2425_v30, %v1022_v26 }
 0xb87   :  { %v1679_v29 = vmul.f32 -1.442695, %v1025_v27 }
 0xb88   :  { %v1067_v31 = vpop.f32.mrf.mxu3 }
 0xb89   :  { %1797 = vpow2.f32 %v1679_v29  ;;  %v1068_v6 = vadd.f32 %v1067_v31, %v1054_v0  ;;  %v2456_v29 = vld [vmem:[#allocation5 + $0x28] sm:$0xff]  ;;  %v2460_v31 = vld [vmem:[#allocation5 + $0x20] sm:$0xff] }
 0xb8a   :  { %v1023_v32 = vpop.f32.mrf.mxu0 }
 0xb8b   :  { %v1071_v22 = vadd.f32 %v2431_v34, %v1068_v6 }
 0xb8d   :  { %v1682_v36 = vmul.f32 -1.442695, %v1071_v22 }
 0xb8f   :  { %v1798_v38 = vpop.eup %1797  ;;  %1799 = vpow2.f32 %v1682_v36 }
 0xb90   :  { %v1029_v45 = vadd.f32 1.0, %v1798_v38  ;;  %v1069_v46 = vpop.f32.mrf.mxu3 }
 0xb92   :  { %1801 = vrcp.f32 %v1029_v45  ;;  %v1100_v47 = vpop.f32.mrf.mxu0  ;;  %v1041_v48 = vand.u32 2147483648, %v1029_v45  ;;  %v1039_v13 = vand.u32 2147483647, %v1029_v45  ;;  %vm1035_vm8 = vweird.f32 %v1029_v45 }
 0xb93   :  { %v1101_v62 = vadd.f32 %v2444_v14, %v1100_v47 }
 0xb94   :  { %v1042_v7 = vor.u32 1.1754944e-38, %v1041_v48  ;;  %vm1040_vm12 = vcmp.eq.f32.partialorder %v1039_v13, 8.507059e+37  ;;  %v1851_v13 = vld [vmem:[%s2558_s7 + $0x8] sm:$0xff] }
 0xb95   :  { %v1800_v49 = vpop.eup %1799 }
 0xb96   :  { %v1075_v50 = vadd.f32 1.0, %v1800_v49 }
 0xb98   :  { %v1802_v54 = vpop.eup %1801  ;;  %1803 = vrcp.f32 %v1075_v50  ;;  %v1087_v63 = vand.u32 2147483648, %v1075_v50  ;;  %v1085_v12 = vand.u32 2147483647, %v1075_v50  ;;  %vm1081_vm14 = vweird.f32 %v1075_v50 }
 0xb99   :  { %v1031_v44 = vmul.f32 %v1802_v54, %v1029_v45  ;;  %vm1036_vm7 = vweird.f32 %v1802_v54 }
 0xb9a   :  { %v1102_v33 = vpop.f32.mrf.mxu0  ;;  %vm1037_vm11 = vmor %vm1035_vm8, %vm1036_vm7  ;;  %v1088_v8 = vor.u32 1.1754944e-38, %v1087_v63  ;;  %vm1086_vm1 = vcmp.eq.f32.partialorder %v1085_v12, 8.507059e+37 }
 0xb9b   :  { %v1032_v55 = vsub.f32 1.0, %v1031_v44 }
 0xb9d   :  { %v1033_v9 = vmul.f32 %v1802_v54, %v1032_v55 }
 0xb9e   :  { %v1804_v57 = vpop.eup %1803 }
 0xb9f   :  { %v1077_v2 = vmul.f32 %v1804_v57, %v1075_v50  ;;  %v1034_v5 = vadd.f32 %v1802_v54, %v1033_v9  ;;  %vm1082_vm13 = vweird.f32 %v1804_v57 }
 0xba0   :  { %vm1083_vm15 = vmor %vm1081_vm14, %vm1082_vm13 }
 0xba1   :  { %v1078_v60 = vsub.f32 1.0, %v1077_v2  ;;  %v1038_v0 = vsel %vm1037_vm11, %v1802_v54, %v1034_v5 }
 0xba2   :  { %v1043_v10 = vsel %vm1040_vm12, %v1042_v7, %v1038_v0 }
 0xba3   :  { %v1079_v4 = vmul.f32 %v1804_v57, %v1078_v60  ;;  %v1117_v11 = vmul.f32 %v1114_v59, %v1043_v10 }
 0xba5   :  { %v1080_v35 = vadd.f32 %v1804_v57, %v1079_v4  ;;  %v1118_v3 = vadd.f32 %v1117_v11, %v1101_v62 }
 0xba7   :  { %v1084_v61 = vsel %vm1083_vm15, %v1804_v57, %v1080_v35  ;;  %1805 = vtanh.f32 %v1118_v3 }
 0xba8   :  { %v1089_v16 = vsel %vm1086_vm1, %v1088_v8, %v1084_v61 }
 0xba9   :  { %v1120_v19 = vsub.f32 1.0, %v1089_v16  ;;  %v1122_v25 = vmul.f32 %v1089_v16, %v2356_v56 }
 0xbad   :  { %v1806_v15 = vpop.eup %1805 }
 0xbae   :  { %v1121_v21 = vmul.f32 %v1806_v15, %v1120_v19 }
 0xbb0   :  { %v2448_v26 = vadd.f32 %v1122_v25, %v1121_v21 }
 0xbb2   :  { %1142 = vst.msk [vmem:[#allocation7 + $0x8] sm:$0x3] %vm378_vm9, %v2448_v26  ;;  %v1124_v27 = vpack.c.bf16 %v2448_v26, %v2448_v26 }
 0xbb4   :  { %1685 = vmatmul.msk.bf16.vlgmr.msrb.gmra.mxu2 %vm142_vm0, %v1124_v27  ;;  %1687 = vmatmul.msk.bf16.vlgmr.msra.gmra.mxu0 %vm142_vm0, %v1124_v27 }
 0xbb5   :  { %1289 = vmatpush.bf16.msrb.mxu2 %v2456_v29  ;;  %1340 = vmatpush.bf16.msra.mxu0 %v2184_v39  ;;  %v1848_v39 = vld [vmem:[%s2553_s2] sm:$0xff] }
 0xbb9   :  { %1290 = vmatpush.bf16.msrb.mxu2 %v2460_v31  ;;  %1341 = vmatpush.bf16.msra.mxu0 %v2190_v40  ;;  %v1849_v40 = vld [vmem:[%s2553_s2 + $0x28] sm:$0xff] }
 0xbbd   :  { %1342 = vmatpush.bf16.msra.mxu0 %v2197_v41  ;;  %v1850_v41 = vld [vmem:[%s2553_s2 + $0x20] sm:$0xff] }
 0xbc1   :  { %1343 = vmatpush.bf16.msra.mxu0 %v2204_v42 }
 0xbc4   :  { %1690 = vmatmul.msk.bf16.vlgmr.msra.gmra.mxu2 %vm142_vm0, %v1124_v27 }
 0xbc5   :  { %1344 = vmatpush.bf16.msra.mxu0 %v2211_v43  ;;  %1376 = vmatpush.bf16.msra.mxu2 %v2375_v17 }
 0xbc9   :  { %1345 = vmatpush.bf16.msra.mxu0 %v2220_v51  ;;  %1377 = vmatpush.bf16.msra.mxu2 %v1848_v39 }
 0xbcd   :  { %1346 = vmatpush.bf16.msra.mxu0 %v2226_v52  ;;  %v1686_v52 = vld [vmem:[%s2561_s10 + $0x8] sm:$0x3] }
 0xbd1   :  { %1347 = vmatpush.bf16.msra.mxu0 %v2233_v53 }
 0xbd4   :  { %1694 = vmatmul.msk.bf16.vlgmr.msrb.gmra.mxu2 %vm142_vm0, %v1124_v27 }
 0xbd5   :  { %1455 = vmatpush.bf16.msrb.mxu2 %v1849_v40 }
 0xbd9   :  { %1456 = vmatpush.bf16.msrb.mxu2 %v1850_v41 }
 0xc31   :  { %v1184_v42 = vpop.f32.mrf.mxu0 }
 0xc37   :  { %v1137_v43 = vpop.f32.mrf.mxu2 }
 0xc38   :  { %v1138_v51 = vadd.f32 %v2172_v24, %v1137_v43 }
 0xc39   :  { %v1186_v56 = vpop.f32.mrf.mxu0 }
 0xc3a   :  { %1144 = vst [vmem:[#allocation8 + $0x8] sm:$0x3] %v1138_v51  ;;  %v1145_v53 = vmul.f32 2.0, %v1138_v51 }
 0xc3c   :  { %v1148_v17 = vadd.f32 %v1686_v52, %v1145_v53 }
 0xc3e   :  { %v1149_v6 = vsel %vm384_vm10, %v1148_v17, -inf }
 0xc3f   :  { %v1139_v32 = vpop.f32.mrf.mxu2  ;;  %1150 = vmax.xlane.f32.xlu2 %v1149_v6 }
 0xc47   :  { %v1233_v22 = vpop.f32.mrf.mxu2 }
 0xc4f   :  { %v1235_v36 = vpop.f32.mrf.mxu2 }
 0xc57   :  { %v2487_v38 = vpop.f32.mrf.mxu2 }
 0xc58   :  { %v1293_v40 = vadd.f32 %v2437_v58, %v2487_v38 }
 0xc5f   :  { %v1294_v45 = vpop.f32.mrf.mxu2 }
 0xcb2   :  { %v1151_v46 = vpop.xlane.xlu2 %1150 }
 0xcb3   :  { %v1152_v47 = vsub.f32 %v1148_v17, %v1151_v46 }
 0xcb5   :  { %v1153_v24 = vmul.f32 1.442695, %v1152_v47 }
 0xcb7   :  { %1807 = vpow2.f32 %v1153_v24 }
 0xcbd   :  { %v1808_v49 = vpop.eup %1807 }
 0xcbe   :  { %v1155_v50 = vsel %vm384_vm10, %v1808_v49, 0.0 }
 0xcbf   :  { %1156 = vadd.xlane.f32.xlu0 %v1155_v50  ;;  %v2526_v50 = vld [vmem:[%s2559_s8] ss:$0 sm:$0xff]  ;;  %s1962_s8 = smov [#allocation7]  }
 0xd32   :  { %v1157_v54 = vpop.xlane.xlu0 %1156 }
 0xd33   :  { %1809 = vrcp.f32 %v1157_v54 }
 0xd39   :  { %v1810_v44 = vpop.eup %1809 }
 0xd3a   :  { %v1159_v33 = vmul.f32 %v1810_v44, %v1808_v49 }
 0xd3c   :  { %v1160_v55 = vpack.c.bf16 %v1159_v33, %v1159_v33 }
 0xd3e   :  { %1169 = vmatmul.bf16.vlgmr.msrb.gmra.mxu3 %v1160_v55 }
 0xd3f   :  { %1409 = vmatpush.bf16.msrb.mxu3 %v2393_v37  ;;  %v1852_v37 = vld [vmem:[%s2558_s7] sm:$0xff] }
 0xd43   :  { %1410 = vmatpush.bf16.msrb.mxu3 %v2396_v18 }
 0xdc1   :  { %v1170_v48 = vpop.f32.mrf.mxu3 }
 0xdc2   :  { %v1174_v9 = vpack.c.bf16 %v1170_v48, %v1170_v48 }
 0xdc4   :  { %1688 = vmatmul.msk.bf16.vlgmr.msra.gmra.mxu1 %vm142_vm0, %v1174_v9  ;;  %1691 = vmatmul.msk.bf16.vlgmr.msrb.gmra.mxu0 %vm142_vm0, %v1174_v9 }
 0xdc5   :  { %1360 = vmatpush.bf16.msra.mxu1 %v2401_v20  ;;  %1492 = vmatpush.bf16.msrb.mxu0 %v1851_v13 }
 0xdc9   :  { %v1172_v57 = vpop.f32.mrf.mxu3  ;;  %1361 = vmatpush.bf16.msra.mxu1 %v2405_v1  ;;  %1493 = vmatpush.bf16.msrb.mxu0 %v1852_v37 }
 0xdd4   :  { %1693 = vmatmul.msk.bf16.vlgmr.msrb.gmra.mxu1 %vm142_vm0, %v1174_v9 }
 0xdd5   :  { %1422 = vmatpush.bf16.msrb.mxu1 %v2413_v23 }
 0xdd9   :  { %1423 = vmatpush.bf16.msrb.mxu1 %v2419_v28 }
 0xe41   :  { %v1200_v18 = vpop.f32.mrf.mxu1  ;;  %v1246_v20 = vpop.f32.mrf.mxu0 }
 0xe42   :  { %v1201_v2 = vadd.f32 %v1200_v18, %v1184_v42  ;;  %v1247_v5 = vadd.f32 %v1246_v20, %v1233_v22 }
 0xe44   :  { %v1204_v7 = vadd.f32 %v2425_v30, %v1201_v2  ;;  %v1250_v59 = vadd.f32 %v2431_v34, %v1247_v5 }
 0xe46   :  { %v1689_v1 = vmul.f32 -1.442695, %v1204_v7  ;;  %v1692_v60 = vmul.f32 -1.442695, %v1250_v59 }
 0xe48   :  { %1811 = vpow2.f32 %v1689_v1 }
 0xe49   :  { %1813 = vpow2.f32 %v1692_v60  ;;  %v1202_v0 = vpop.f32.mrf.mxu1  ;;  %v1248_v10 = vpop.f32.mrf.mxu0 }
 0xe4e   :  { %v1812_v62 = vpop.eup %1811 }
 0xe4f   :  { %v1814_v4 = vpop.eup %1813  ;;  %v1208_v63 = vadd.f32 1.0, %v1812_v62 }
 0xe50   :  { %v1254_v23 = vadd.f32 1.0, %v1814_v4 }
 0xe51   :  { %1815 = vrcp.f32 %v1208_v63  ;;  %v1279_v28 = vpop.f32.mrf.mxu1  ;;  %v1220_v19 = vand.u32 2147483648, %v1208_v63  ;;  %v1218_v21 = vand.u32 2147483647, %v1208_v63  ;;  %vm1214_vm3 = vweird.f32 %v1208_v63 }
 0xe52   :  { %1817 = vrcp.f32 %v1254_v23  ;;  %v1266_v51 = vand.u32 2147483648, %v1254_v23  ;;  %v1280_v56 = vadd.f32 %v2444_v14, %v1279_v28  ;;  %vm1260_vm7 = vweird.f32 %v1254_v23 }
 0xe53   :  { %v1221_v39 = vor.u32 1.1754944e-38, %v1220_v19  ;;  %vm1219_vm5 = vcmp.eq.f32.partialorder %v1218_v21, 8.507059e+37  ;;  %v1264_v53 = vand.u32 2147483647, %v1254_v23 }
 0xe54   :  { %v1267_v32 = vor.u32 1.1754944e-38, %v1266_v51 }
 0xe55   :  { %vm1265_vm11 = vcmp.eq.f32.partialorder %v1264_v53, 8.507059e+37 }
 0xe57   :  { %v1816_v11 = vpop.eup %1815 }
 0xe58   :  { %v1818_v12 = vpop.eup %1817  ;;  %v1210_v35 = vmul.f32 %v1816_v11, %v1208_v63  ;;  %vm1215_vm2 = vweird.f32 %v1816_v11 }
 0xe59   :  { %v1256_v3 = vmul.f32 %v1818_v12, %v1254_v23  ;;  %v1281_v61 = vpop.f32.mrf.mxu1  ;;  %vm1216_vm4 = vmor %vm1214_vm3, %vm1215_vm2  ;;  %vm1261_vm6 = vweird.f32 %v1818_v12 }
 0xe5a   :  { %v1211_v8 = vsub.f32 1.0, %v1210_v35  ;;  %vm1262_vm8 = vmor %vm1260_vm7, %vm1261_vm6 }
 0xe5b   :  { %v1257_v16 = vsub.f32 1.0, %v1256_v3 }
 0xe5c   :  { %v1212_v15 = vmul.f32 %v1816_v11, %v1211_v8 }
 0xe5d   :  { %v1258_v25 = vmul.f32 %v1818_v12, %v1257_v16 }
 0xe5e   :  { %v1213_v27 = vadd.f32 %v1816_v11, %v1212_v15 }
 0xe5f   :  { %v1259_v43 = vadd.f32 %v1818_v12, %v1258_v25 }
 0xe60   :  { %v1217_v41 = vsel %vm1216_vm4, %v1816_v11, %v1213_v27 }
 0xe61   :  { %v1222_v42 = vsel %vm1219_vm5, %v1221_v39, %v1217_v41  ;;  %v1263_v6 = vsel %vm1262_vm8, %v1818_v12, %v1259_v43 }
 0xe62   :  { %v1296_v52 = vmul.f32 %v1293_v40, %v1222_v42  ;;  %v1268_v22 = vsel %vm1265_vm11, %v1267_v32, %v1263_v6 }
 0xe63   :  { %v1299_v36 = vsub.f32 1.0, %v1268_v22  ;;  %v1301_v46 = vmul.f32 %v1268_v22, %v2448_v26 }
 0xe64   :  { %v1297_v17 = vadd.f32 %v1296_v52, %v1280_v56 }
 0xe66   :  { %1819 = vtanh.f32 %v1297_v17 }
 0xe6c   :  { %v1820_v38 = vpop.eup %1819 }
 0xe6d   :  { %v1300_v45 = vmul.f32 %v1820_v38, %v1299_v36 }
 0xe6f   :  { %v2511_v47 = vadd.f32 %v1301_v46, %v1300_v45 }
 0xe71   :  { %1321 = vst.msk [vmem:[#allocation7 + $0xa] sm:$0x3] %vm378_vm9, %v2511_v47  ;;  %v1303_v24 = vpack.c.bf16 %v2511_v47, %v2511_v47 }
 0xe73   :  { %1695 = vmatmul.msk.bf16.vlgmr.msra.gmra.mxu3 %vm142_vm0, %v1303_v24  ;;  %1697 = vmatmul.msk.bf16.vlgmr.msra.gmra.mxu1 %vm142_vm0, %v1303_v24 }
 0xe74   :  { %1468 = vmatpush.bf16.msra.mxu3 %v2456_v29  ;;  %v1696_v29 = vld [vmem:[%s2561_s10 + $0xa] sm:$0x3]  ;;  %s1507_s10 = sshll.u32 %s1962_s8, 4  ;;  %s1508_s10 = int_to_ptr.vmem [resolvable:$true] %s1507_s10 }
 0xe78   :  { %1469 = vmatpush.bf16.msra.mxu3 %v2460_v31 }
 0xe83   :  { %1700 = vmatmul.msk.bf16.vlgmr.msrb.gmra.mxu3 %vm142_vm0, %v1303_v24 }
 0xe93   :  { %1704 = vmatmul.msk.bf16.vlgmr.msra.gmra.mxu3 %vm142_vm0, %v1303_v24 }
 0xef0   :  { %v1363_v26 = vpop.f32.mrf.mxu1 }
 0xef6   :  { %v1316_v49 = vpop.f32.mrf.mxu3 }
 0xef7   :  { %v1317_v54 = vadd.f32 %v2526_v50, %v1316_v49 }
 0xef8   :  { %v1365_v44 = vpop.f32.mrf.mxu1 }
 0xef9   :  { %1323 = vst [vmem:[#allocation8 + $0xa] sm:$0x3] %v1317_v54  ;;  %v1324_v31 = vmul.f32 2.0, %v1317_v54 }
 0xefb   :  { %v1327_v33 = vadd.f32 %v1696_v29, %v1324_v31 }
 0xefd   :  { %v1328_v55 = vsel %vm384_vm10, %v1327_v33, -inf }
 0xefe   :  { %v1318_v48 = vpop.f32.mrf.mxu3  ;;  %1329 = vmax.xlane.f32.xlu1 %v1328_v55 }
 0xf06   :  { %v1412_v9 = vpop.f32.mrf.mxu3 }
 0xf0e   :  { %v1414_v13 = vpop.f32.mrf.mxu3 }
 0xf16   :  { %v1471_v57 = vpop.f32.mrf.mxu3 }
 0xf17   :  { %v1472_v32 = vadd.f32 %v2437_v58, %v1471_v57 }
 0xf1e   :  { %v1473_v37 = vpop.f32.mrf.mxu3 }
 0xf71   :  { %v1330_v18 = vpop.xlane.xlu1 %1329 }
 0xf72   :  { %v1331_v20 = vsub.f32 %v1327_v33, %v1330_v18 }
 0xf74   :  { %v1332_v2 = vmul.f32 1.442695, %v1331_v20 }
 0xf76   :  { %1821 = vpow2.f32 %v1332_v2 }
 0xf7c   :  { %v1822_v5 = vpop.eup %1821 }
 0xf7d   :  { %v1334_v7 = vsel %vm384_vm10, %v1822_v5, 0.0 }
 0xf7e   :  { %1335 = vadd.xlane.f32.xlu2 %v1334_v7 }
 0xff1   :  { %v1336_v59 = vpop.xlane.xlu2 %1335 }
 0xff2   :  { %1823 = vrcp.f32 %v1336_v59 }
 0xff8   :  { %v1824_v1 = vpop.eup %1823 }
 0xff9   :  { %v1338_v60 = vmul.f32 %v1824_v1, %v1822_v5 }
 0xffb   :  { %v1339_v0 = vpack.c.bf16 %v1338_v60, %v1338_v60 }
 0xffd   :  { %1348 = vmatmul.bf16.vlgmr.msra.gmra.mxu0 %v1339_v0 }
0x107a   :  { %v1349_v10 = vpop.f32.mrf.mxu0 }
0x107b   :  { %v1353_v62 = vpack.c.bf16 %v1349_v10, %v1349_v10 }
0x107d   :  { %1698 = vmatmul.msk.bf16.vlgmr.msra.gmra.mxu2 %vm142_vm0, %v1353_v62  ;;  %1701 = vmatmul.msk.bf16.vlgmr.msrb.gmra.mxu1 %vm142_vm0, %v1353_v62 }
0x1082   :  { %v1351_v4 = vpop.f32.mrf.mxu0 }
0x108d   :  { %1703 = vmatmul.msk.bf16.vlgmr.msrb.gmra.mxu2 %vm142_vm0, %v1353_v62 }
0x10fa   :  { %v1425_v63 = vpop.f32.mrf.mxu1 }
0x10fb   :  { %v1426_v23 = vadd.f32 %v1425_v63, %v1412_v9 }
0x10fd   :  { %v1429_v28 = vadd.f32 %v2431_v34, %v1426_v23 }
0x10ff   :  { %v1702_v11 = vmul.f32 -1.442695, %v1429_v28 }
0x1100   :  { %v1379_v12 = vpop.f32.mrf.mxu2 }
0x1101   :  { %1825 = vpow2.f32 %v1702_v11  ;;  %v1380_v35 = vadd.f32 %v1379_v12, %v1363_v26 }
0x1102   :  { %v1427_v3 = vpop.f32.mrf.mxu1 }
0x1103   :  { %v1383_v61 = vadd.f32 %v2425_v30, %v1380_v35 }
0x1105   :  { %v1699_v8 = vmul.f32 -1.442695, %v1383_v61 }
0x1107   :  { %v1826_v16 = vpop.eup %1825  ;;  %1827 = vpow2.f32 %v1699_v8 }
0x1108   :  { %v1433_v19 = vadd.f32 1.0, %v1826_v16  ;;  %v1381_v15 = vpop.f32.mrf.mxu2 }
0x110a   :  { %1829 = vrcp.f32 %v1433_v19  ;;  %v1445_v45 = vand.u32 2147483648, %v1433_v19  ;;  %vm1439_vm1 = vweird.f32 %v1433_v19  ;;  %v1443_v26 = vand.u32 2147483647, %v1433_v19 }
0x110c   :  { %v1446_v44 = vor.u32 1.1754944e-38, %v1445_v45  ;;  %vm1444_vm3 = vcmp.eq.f32.partialorder %v1443_v26, 8.507059e+37 }
0x110d   :  { %v1828_v21 = vpop.eup %1827 }
0x110e   :  { %v1387_v25 = vadd.f32 1.0, %v1828_v21 }
0x1110   :  { %1831 = vrcp.f32 %v1387_v25  ;;  %v1458_v27 = vpop.f32.mrf.mxu2  ;;  %v1830_v39 = vpop.eup %1829  ;;  %v1399_v56 = vand.u32 2147483648, %v1387_v25  ;;  %v1397_v30 = vand.u32 2147483647, %v1387_v25  ;;  %vm1393_vm12 = vweird.f32 %v1387_v25 }
0x1111   :  { %v1435_v40 = vmul.f32 %v1830_v39, %v1433_v19  ;;  %vm1440_vm15 = vweird.f32 %v1830_v39  ;;  %v1459_v46 = vadd.f32 %v2444_v14, %v1458_v27 }
0x1112   :  { %v1400_v6 = vor.u32 1.1754944e-38, %v1399_v56  ;;  %vm1398_vm14 = vcmp.eq.f32.partialorder %v1397_v30, 8.507059e+37  ;;  %vm1441_vm2 = vmor %vm1439_vm1, %vm1440_vm15 }
0x1113   :  { %v1436_v42 = vsub.f32 1.0, %v1435_v40 }
0x1115   :  { %v1437_v53 = vmul.f32 %v1830_v39, %v1436_v42 }
0x1116   :  { %v1832_v34 = vpop.eup %1831 }
0x1117   :  { %v1389_v41 = vmul.f32 %v1832_v34, %v1387_v25  ;;  %vm1394_vm10 = vweird.f32 %v1832_v34  ;;  %v1438_v38 = vadd.f32 %v1830_v39, %v1437_v53 }
0x1118   :  { %v1460_v43 = vpop.f32.mrf.mxu2  ;;  %vm1395_vm13 = vmor %vm1393_vm12, %vm1394_vm10 }
0x1119   :  { %v1390_v51 = vsub.f32 1.0, %v1389_v41  ;;  %v1442_v54 = vsel %vm1441_vm2, %v1830_v39, %v1438_v38 }
0x111a   :  { %v1447_v29 = vsel %vm1444_vm3, %v1446_v44, %v1442_v54 }
0x111b   :  { %v1391_v52 = vmul.f32 %v1832_v34, %v1390_v51  ;;  %v1478_v31 = vsub.f32 1.0, %v1447_v29  ;;  %v1480_v55 = vmul.f32 %v1447_v29, %v2511_v47 }
0x111d   :  { %v1392_v17 = vadd.f32 %v1832_v34, %v1391_v52 }
0x111f   :  { %v1396_v22 = vsel %vm1395_vm13, %v1832_v34, %v1392_v17 }
0x1120   :  { %v1401_v36 = vsel %vm1398_vm14, %v1400_v6, %v1396_v22 }
0x1121   :  { %v1475_v24 = vmul.f32 %v1472_v32, %v1401_v36 }
0x1123   :  { %v1476_v49 = vadd.f32 %v1475_v24, %v1459_v46 }
0x1125   :  { %1833 = vtanh.f32 %v1476_v49 }
0x112b   :  { %v1834_v58 = vpop.eup %1833 }
0x112c   :  { %v1479_v33 = vmul.f32 %v1834_v58, %v1478_v31 }
0x112e   :  { %v1481_v48 = vadd.f32 %v1480_v55, %v1479_v33 }
0x1130   :  { %v1482_v9 = vpack.c.bf16 %v1481_v48, %v1481_v48  ;;  %1500 = vst.msk [vmem:[#allocation7 + $0xc] sm:$0x3] %vm378_vm9, %v1481_v48 }
0x1131   :  { %1515 = dma.vmem_to_hbm [thread:$0]  %s1508_s10, 224, %s1510_s26, [#allocation4], %s1963_s27, %s1963_s27, %s1964_s28  }
0x1132   :  { %1705 = vmatmul.msk.bf16.vlgmr.msrb.gmra.mxu0 %vm142_vm0, %v1482_v9 }
0x11af   :  { %v1495_v14 = vpop.f32.mrf.mxu0 }
0x11b0   :  { %v1496_v47 = vadd.f32 %v2526_v50, %v1495_v14 }
0x11b2   :  { %1502 = vst [vmem:[#allocation8 + $0xc] sm:$0x3] %v1496_v47 }
0x11b3   :  { %1528 = dma.vmem_to_hbm [thread:$0]  %s1521_s30, 224, %s1523_s14, [#allocation9], %s1963_s27, %s1963_s27, %s1964_s28  }
0x11b7   :  { %v1497_v13 = vpop.f32.mrf.mxu0 }
0x11b8   :  { %1954 = dma.done.wait [#allocation4], 224  }
0x11b9   :  { %1955 = vsyncadd [#allocation4], 4294967072 }
0x11ba   :  { %1956 = dma.done.wait [#allocation9], 224  }
0x11bb   :  { %1957 = vsyncadd [#allocation9], 4294967072 }
0x11bc   :  { %1537 = vsyncpa [#allocation3], 1 }
0x11bd   :  { %1538 = vsyncpa [#allocation6], 1 }
0x11be   :  { %1539 = vsyncpa [#allocation4], 1 }
0x11bf   :  { %1540 = vsyncpa [#allocation9], 1 }

</bundles_post_ra>
